<compile_context>
chip_gen: v6e
topology: v6e:2x2x1
jax: 0.10.0
libtpu: 0.0.40
codegen_flags: <defaults>
</compile_context>

<pallas_src>
from functools import partial

import jax
import jax.numpy as jnp
from jax.experimental import pallas as pl
from jax.experimental.pallas import tpu as pltpu

LEAKY_SLOPE = 0.01
BN_EPS = 1e-5


def _round_up(x, m):
    return (x + m - 1) // m * m


# ----------------------------------------------------------------------------
# Pallas kernels
# ----------------------------------------------------------------------------
def conv3d_im2col_kernel(xl_ref, xm_ref, xr_ref, w_ref, mask_ref,
                         y_ref, stat_ref, win_ref, slab_ref, *, taps):
    """One column tile of a centered, tap-decomposed 3x3x3 conv (channel-major).

    xl/xm/xr_ref : [Cin_p, HALO] / [Cin_p, TM] / [Cin_p, HALO] bf16 input blocks
    w_ref        : [Cout_p, 27*Cin_p] bf16, K ordered tap-major / channel-minor
    mask_ref     : [1, TM] bf16, 1.0 where the column is a real voxel
    y_ref        : [Cout_p, TM] bf16 conv output (bias-free; BN cancels it)
    stat_ref     : [2*Cout_p, 128] f32 masked per-channel partial sum / sumsq
    win_ref      : [Cin_p, TM+2*HALO] bf16 scratch (haloed window)
    slab_ref     : [27*Cin_p, TM] bf16 scratch (im2col slab)
    """
    cin_p, tm = xm_ref.shape
    halo = xl_ref.shape[1]
    cout_p = w_ref.shape[0]

    # Assemble the haloed window with lane-aligned copies.
    win_ref[:, :halo] = xl_ref[...]
    win_ref[:, halo:halo + tm] = xm_ref[...]
    win_ref[:, halo + tm:] = xr_ref[...]

    # im2col slab: 27 statically-shifted [Cin_p, TM] copies stacked on sublanes.
    for t, off in enumerate(taps):                       # static python loop
        slab_ref[t * cin_p:(t + 1) * cin_p, :] = win_ref[:, off:off + tm]

    # Single big-K MXU matmul (K = 27*Cin_p), f32 accumulation.
    acc = jnp.dot(w_ref[...], slab_ref[...], preferred_element_type=jnp.float32)
    y_ref[...] = acc.astype(y_ref.dtype)

    # Fused, masked BatchNorm partial statistics (pad / tail columns excluded).
    m = mask_ref[...].astype(jnp.float32)                # [1, TM]
    ym = acc * m
    stat_ref[:cout_p, :] = jnp.broadcast_to(
        jnp.sum(ym, axis=1, keepdims=True), (cout_p, 128))
    stat_ref[cout_p:, :] = jnp.broadcast_to(
        jnp.sum(ym * ym, axis=1, keepdims=True), (cout_p, 128))


def bn_lrelu_kernel(y_ref, scale_ref, shift_ref, mask_ref, o_ref):
    """Tiled, lane-dense BatchNorm affine + LeakyReLU; border/tail columns -> 0."""
    z = y_ref[...].astype(jnp.float32) * scale_ref[...] + shift_ref[...]
    a = jnp.where(z >= 0, z, LEAKY_SLOPE * z)
    o_ref[...] = (a * mask_ref[...].astype(jnp.float32)).astype(o_ref.dtype)


# ----------------------------------------------------------------------------
# pallas_call wrappers
# ----------------------------------------------------------------------------
def conv3d_pallas(xp, w_k, mask, *, shift_cols, hp, wp, tm, halo, n_tiles,
                  y_dtype):
    """xp: [Cin_p, n_tiles*TM] bf16 flattened, border zero-padded, channel-major."""
    cin_p, cols = xp.shape
    cout_p = w_k.shape[0]
    hb = tm // halo                       # halo blocks per main tile
    n_hblk = cols // halo                 # halo blocks in the whole array
    # Centered taps: window column = HALO - shift + (kd*hp*wp + kh*wp + kw).
    taps = tuple(halo - shift_cols + kd * hp * wp + kh * wp + kw
                 for kd in range(3) for kh in range(3) for kw in range(3))
    kernel = partial(conv3d_im2col_kernel, taps=taps)
    return pl.pallas_call(
        kernel,
        out_shape=(jax.ShapeDtypeStruct((cout_p, cols), y_dtype),
                   jax.ShapeDtypeStruct((2 * cout_p, n_tiles * 128), jnp.float32)),
        grid=(n_tiles,),
        in_specs=[
            # Left halo (clamped at i=0: that data only feeds masked outputs).
            pl.BlockSpec((cin_p, halo), lambda i: (0, jnp.maximum(i * hb - 1, 0))),
            # Main tile.
            pl.BlockSpec((cin_p, tm), lambda i: (0, i)),
            # Right halo (clamped on the last tile: only feeds masked outputs).
            pl.BlockSpec((cin_p, halo),
                         lambda i: (0, jnp.minimum((i + 1) * hb, n_hblk - 1))),
            # Resident, lane-dense repacked weights.
            pl.BlockSpec(w_k.shape, lambda i: (0, 0)),
            # Validity mask (bf16).
            pl.BlockSpec((1, tm), lambda i: (0, i)),
        ],
        out_specs=(pl.BlockSpec((cout_p, tm), lambda i: (0, i)),
                   pl.BlockSpec((2 * cout_p, 128), lambda i: (0, i))),
        scratch_shapes=[pltpu.VMEM((cin_p, tm + 2 * halo), jnp.bfloat16),
                        pltpu.VMEM((27 * cin_p, tm), jnp.bfloat16)],
        compiler_params=pltpu.CompilerParams(dimension_semantics=("parallel",)),
    )(xp, xp, xp, w_k, mask)


def bn_lrelu_pallas(y, scale, shift, mask, *, tm, out_dtype):
    cout_p, cols = y.shape
    n_tiles = cols // tm
    return pl.pallas_call(
        bn_lrelu_kernel,
        out_shape=jax.ShapeDtypeStruct((cout_p, cols), out_dtype),
        grid=(n_tiles,),
        in_specs=[
            pl.BlockSpec((cout_p, tm), lambda i: (0, i)),
            pl.BlockSpec((cout_p, 1), lambda i: (0, 0)),
            pl.BlockSpec((cout_p, 1), lambda i: (0, 0)),
            pl.BlockSpec((1, tm), lambda i: (0, i)),
        ],
        out_specs=pl.BlockSpec((cout_p, tm), lambda i: (0, i)),
        compiler_params=pltpu.CompilerParams(dimension_semantics=("parallel",)),
    )(y, scale, shift, mask)


def _bn_scale_shift(stats, gamma, beta, count, cout, cout_p, n_tiles):
    """Fold per-tile partial stats into per-channel BN scale / shift (tiny)."""
    st = jnp.sum(stats.reshape(2 * cout_p, n_tiles, 128)[:, :, 0], axis=1)
    s = st[:cout]
    sq = st[cout_p:cout_p + cout]
    mean = s / count
    # Single-pass variance; clamp >=0 to guard against f32 cancellation.
    var = jnp.maximum(sq / count - mean * mean, 0.0)
    inv = jax.lax.rsqrt(var + BN_EPS)
    scale = gamma * inv
    shift = beta - mean * scale
    scale = jnp.pad(scale, (0, cout_p - cout)).reshape(cout_p, 1)
    shift = jnp.pad(shift, (0, cout_p - cout)).reshape(cout_p, 1)
    return scale, shift


def pack_conv_weight(w_dhwio, cin_pad, cout_pad):
    """[3,3,3,Cin,Cout] (DHWIO) -> [Cout_pad, 27*Cin_pad], K = (kd,kh,kw)-major."""
    kd, kh, kw, cin, cout = w_dhwio.shape
    wk = jnp.transpose(w_dhwio, (4, 0, 1, 2, 3)).reshape(cout, kd * kh * kw, cin)
    wk = jnp.pad(wk, ((0, cout_pad - cout), (0, 0), (0, cin_pad - cin)))
    return wk.reshape(cout_pad, kd * kh * kw * cin_pad)


# ----------------------------------------------------------------------------
# Forward pass (matches CONVx2.forward; NCDHW in / NCDHW out)
# ----------------------------------------------------------------------------
@partial(jax.jit, static_argnames=("tile_cols",))
def convx2_forward(x_ncdhw, params, tile_cols=4096):
    n, cin, d, h, w = x_ncdhw.shape
    cout = params["g1"].shape[0]
    dp, hp, wp = d + 2, h + 2, w + 2
    qvol = dp * hp * wp
    cols_valid = n * qvol
    count = n * d * h * w
    shift_cols = hp * wp + wp + 1          # flat offset of a (+1,+1,+1) shift

    cin_p = _round_up(cin, 8)
    cmid_p = _round_up(cout, 8)

    # Halo width: centered taps need +/- shift_cols of context.
    halo = _round_up(shift_cols, 128)
    # Column tile: big (amortize per-step cost), but (a) keep the im2col slab
    # well under the scoped VMEM limit (v7x: 32 MiB default) and (b) use >=2
    # tiles when possible so both v7x TensorCores get work.  Always a multiple
    # of HALO (hence of 128 -> lane-dense blocks).
    vmem_cap_cols = max(halo, (12 << 20) // (27 * max(cin_p, cmid_p) * 2))
    tm = min(max(tile_cols, halo), vmem_cap_cols, max(pl.cdiv(cols_valid, 2), halo))
    tm = _round_up(tm, halo)
    n_tiles = pl.cdiv(cols_valid, tm)
    cols_out = n_tiles * tm

    # Validity mask in padded coords (interior voxels), bf16, tail zero-padded.
    mask = jnp.pad(jnp.ones((n, d, h, w), jnp.bfloat16),
                   ((0, 0), (1, 1), (1, 1), (1, 1)))
    mask = jnp.pad(mask.reshape(1, cols_valid), ((0, 0), (0, cols_out - cols_valid)))

    # Layer-1 input: NCDHW -> channel-major, border zero-padded, flattened, bf16.
    # TODO(synk): when chaining layers, keep activations in this channel-major
    # flattened layout across modules to avoid the entry/exit transposes.
    xc = jnp.transpose(x_ncdhw, (1, 0, 2, 3, 4)).astype(jnp.bfloat16)
    xc = jnp.pad(xc, ((0, cin_p - cin), (0, 0), (1, 1), (1, 1), (1, 1)))
    xp0 = jnp.pad(xc.reshape(cin_p, cols_valid),
                  ((0, 0), (0, cols_out - cols_valid)))

    w1 = params["w1"].astype(jnp.bfloat16)     # [cmid_p, 27*cin_p]
    w2 = params["w2"].astype(jnp.bfloat16)     # [cmid_p, 27*cmid_p]

    # ---- block 1: conv (fused masked stats) -> BN + LeakyReLU ----
    y1, st1 = conv3d_pallas(xp0, w1, mask, shift_cols=shift_cols, hp=hp, wp=wp,
                            tm=tm, halo=halo, n_tiles=n_tiles,
                            y_dtype=jnp.bfloat16)
    sc1, sh1 = _bn_scale_shift(st1, params["g1"], params["be1"], count,
                               cout, cmid_p, n_tiles)
    a1 = bn_lrelu_pallas(y1, sc1, sh1, mask, tm=tm, out_dtype=jnp.bfloat16)

    # ---- block 2: a1 IS already the flattened zero-padded input of conv 2 ----
    y2, st2 = conv3d_pallas(a1, w2, mask, shift_cols=shift_cols, hp=hp, wp=wp,
                            tm=tm, halo=halo, n_tiles=n_tiles,
                            y_dtype=jnp.bfloat16)
    sc2, sh2 = _bn_scale_shift(st2, params["g2"], params["be2"], count,
                               cout, cmid_p, n_tiles)
    a2 = bn_lrelu_pallas(y2, sc2, sh2, mask, tm=tm, out_dtype=jnp.float32)

    # Back to NCDHW (column j of padded coords (dd,hh,ww) holds voxel (dd-1,hh-1,ww-1)).
    out = a2[:cout, :cols_valid].reshape(cout, n, dp, hp, wp)
    out = out[:, :, 1:1 + d, 1:1 + h, 1:1 + w]
    return jnp.transpose(out, (1, 0, 2, 3, 4))


# ----------------------------------------------------------------------------
# Pure-JAX f32 reference (correctness check only)
# ----------------------------------------------------------------------------
def _ref_block(x, w_dhwio, bias, gamma, beta):
    y = jax.lax.conv_general_dilated(
        x, w_dhwio, window_strides=(1, 1, 1), padding="SAME",
        dimension_numbers=("NDHWC", "DHWIO", "NDHWC")) + bias
    mean = jnp.mean(y, axis=(0, 1, 2, 3), keepdims=True)
    var = jnp.mean(jnp.square(y - mean), axis=(0, 1, 2, 3), keepdims=True)
    z = (y - mean) * jax.lax.rsqrt(var + BN_EPS) * gamma + beta
    return jnp.where(z >= 0, z, LEAKY_SLOPE * z)


def ref_forward(x_ncdhw, w1, b1, g1, be1, w2, b2, g2, be2):
    x = jnp.transpose(x_ncdhw, (0, 2, 3, 4, 1))
    y = _ref_block(x, w1, b1, g1, be1)
    y = _ref_block(y, w2, b2, g2, be2)
    return jnp.transpose(y, (0, 4, 1, 2, 3))


# ----------------------------------------------------------------------------
if __name__ == "__main__":
    key = jax.random.PRNGKey(0)
    N, Cin, Cout, D, H, W = 2, 4, 8, 8, 8, 8
    k0, k1, k2, k3, k4, k5, k6, k7, k8 = jax.random.split(key, 9)

    x = jax.random.normal(k0, (N, Cin, D, H, W), jnp.float32)

    w1_dhwio = jax.random.normal(k1, (3, 3, 3, Cin, Cout), jnp.float32) * 0.1
    b1 = jax.random.normal(k2, (Cout,), jnp.float32) * 0.01
    w2_dhwio = jax.random.normal(k3, (3, 3, 3, Cout, Cout), jnp.float32) * 0.1
    b2 = jax.random.normal(k4, (Cout,), jnp.float32) * 0.01

    g1 = 1.0 + 0.1 * jax.random.normal(k5, (Cout,), jnp.float32)
    be1 = 0.1 * jax.random.normal(k6, (Cout,), jnp.float32)
    g2 = 1.0 + 0.1 * jax.random.normal(k7, (Cout,), jnp.float32)
    be2 = 0.1 * jax.random.normal(k8, (Cout,), jnp.float32)

    params = dict(
        w1=pack_conv_weight(w1_dhwio, _round_up(Cin, 8), _round_up(Cout, 8)),
        w2=pack_conv_weight(w2_dhwio, _round_up(Cout, 8), _round_up(Cout, 8)),
        g1=g1, be1=be1, g2=g2, be2=be2,
    )

    out = jax.block_until_ready(convx2_forward(x, params))
    assert out.shape == (N, Cout, D, H, W), out.shape

    # Reference keeps the conv bias; the kernel drops it (training-mode BN
    # subtracts the batch mean, so a per-channel constant cancels exactly).
    ref = ref_forward(x, w1_dhwio, b1, g1, be1, w2_dhwio, b2, g2, be2)
    max_err = float(jnp.max(jnp.abs(out - ref)))
    # bf16 matmul operands, bf16 conv intermediates, bf16 inter-layer activation.
    assert jnp.allclose(out, ref, atol=4e-2, rtol=4e-2), max_err

    print("KERNEL_OK")
</pallas_src>

<mosaic_0001>
module attributes {stable_mosaic.version = 11 : i64} {
  func.func @conv3d_im2col_kernel(%arg0: i32, %arg1: memref<8x128xbf16, #tpu.memory_space<vmem>>, %arg2: memref<8x1024xbf16, #tpu.memory_space<vmem>>, %arg3: memref<8x128xbf16, #tpu.memory_space<vmem>>, %arg4: memref<8x216xbf16, #tpu.memory_space<vmem>>, %arg5: memref<1x1024xbf16, #tpu.memory_space<vmem>>, %arg6: memref<8x1024xbf16, #tpu.memory_space<vmem>>, %arg7: memref<16x128xf32, #tpu.memory_space<vmem>>, %arg8: memref<8x1280xbf16, #tpu.memory_space<vmem>>, %arg9: memref<216x1024xbf16, #tpu.memory_space<vmem>>) attributes {dimension_semantics = [#tpu.dimension_semantics<parallel>], iteration_bounds = array<i64: 2>, scalar_prefetch = 0 : i64, scratch_operands = 2 : i64, tpu.core_type = #tpu.core_type<tc>, window_params = [{transform_indices = @transform_0, window_bounds = array<i64: 8, 128>}, {transform_indices = @transform_1, window_bounds = array<i64: 8, 1024>}, {transform_indices = @transform_2, window_bounds = array<i64: 8, 128>}, {pipeline_mode = #tpu.pipeline_mode<synchronous>, transform_indices = @transform_3, window_bounds = array<i64: 8, 216>}, {transform_indices = @transform_4, window_bounds = array<i64: 1, 1024>}, {transform_indices = @transform_5, window_bounds = array<i64: 8, 1024>}, {transform_indices = @transform_6, window_bounds = array<i64: 16, 128>}]} {
    %c0 = arith.constant 0 : index
    %c0_0 = arith.constant 0 : index
    %0 = vector.load %arg1[%c0, %c0_0] : memref<8x128xbf16, #tpu.memory_space<vmem>>, vector<8x128xbf16>
    %c0_1 = arith.constant 0 : index
    %c0_2 = arith.constant 0 : index
    %1 = vector.load %arg8[%c0_1, %c0_2] : memref<8x1280xbf16, #tpu.memory_space<vmem>>, vector<8x128xbf16>
    tpu.vector_store %arg8[%c0_1, %c0_2], %0 {strides = array<i32>} : memref<8x1280xbf16, #tpu.memory_space<vmem>>, vector<8x128xbf16>,
    %c0_3 = arith.constant 0 : index
    %c0_4 = arith.constant 0 : index
    %2 = vector.load %arg2[%c0_3, %c0_4] : memref<8x1024xbf16, #tpu.memory_space<vmem>>, vector<8x1024xbf16>
    %c0_5 = arith.constant 0 : index
    %c128 = arith.constant 128 : index
    %3 = vector.load %arg8[%c0_5, %c128] : memref<8x1280xbf16, #tpu.memory_space<vmem>>, vector<8x1024xbf16>
    tpu.vector_store %arg8[%c0_5, %c128], %2 {strides = array<i32>} : memref<8x1280xbf16, #tpu.memory_space<vmem>>, vector<8x1024xbf16>,
    %c0_6 = arith.constant 0 : index
    %c0_7 = arith.constant 0 : index
    %4 = vector.load %arg3[%c0_6, %c0_7] : memref<8x128xbf16, #tpu.memory_space<vmem>>, vector<8x128xbf16>
    %c0_8 = arith.constant 0 : index
    %c1152 = arith.constant 1152 : index
    %5 = vector.load %arg8[%c0_8, %c1152] : memref<8x1280xbf16, #tpu.memory_space<vmem>>, vector<8x128xbf16>
    tpu.vector_store %arg8[%c0_8, %c1152], %4 {strides = array<i32>} : memref<8x1280xbf16, #tpu.memory_space<vmem>>, vector<8x128xbf16>,
    %c0_9 = arith.constant 0 : index
    %c17 = arith.constant 17 : index
    %6 = vector.load %arg8[%c0_9, %c17] : memref<8x1280xbf16, #tpu.memory_space<vmem>>, vector<8x1024xbf16>
    %c0_10 = arith.constant 0 : index
    %c0_11 = arith.constant 0 : index
    %7 = vector.load %arg9[%c0_10, %c0_11] : memref<216x1024xbf16, #tpu.memory_space<vmem>>, vector<8x1024xbf16>
    tpu.vector_store %arg9[%c0_10, %c0_11], %6 {strides = array<i32>} : memref<216x1024xbf16, #tpu.memory_space<vmem>>, vector<8x1024xbf16>,
    %c0_12 = arith.constant 0 : index
    %c18 = arith.constant 18 : index
    %8 = vector.load %arg8[%c0_12, %c18] : memref<8x1280xbf16, #tpu.memory_space<vmem>>, vector<8x1024xbf16>
    %c8 = arith.constant 8 : index
    %c0_13 = arith.constant 0 : index
    %9 = vector.load %arg9[%c8, %c0_13] : memref<216x1024xbf16, #tpu.memory_space<vmem>>, vector<8x1024xbf16>
    tpu.vector_store %arg9[%c8, %c0_13], %8 {strides = array<i32>} : memref<216x1024xbf16, #tpu.memory_space<vmem>>, vector<8x1024xbf16>,
    %c0_14 = arith.constant 0 : index
    %c19 = arith.constant 19 : index
    %10 = vector.load %arg8[%c0_14, %c19] : memref<8x1280xbf16, #tpu.memory_space<vmem>>, vector<8x1024xbf16>
    %c16 = arith.constant 16 : index
    %c0_15 = arith.constant 0 : index
    %11 = vector.load %arg9[%c16, %c0_15] : memref<216x1024xbf16, #tpu.memory_space<vmem>>, vector<8x1024xbf16>
    tpu.vector_store %arg9[%c16, %c0_15], %10 {strides = array<i32>} : memref<216x1024xbf16, #tpu.memory_space<vmem>>, vector<8x1024xbf16>,
    %c0_16 = arith.constant 0 : index
    %c27 = arith.constant 27 : index
    %12 = vector.load %arg8[%c0_16, %c27] : memref<8x1280xbf16, #tpu.memory_space<vmem>>, vector<8x1024xbf16>
    %c24 = arith.constant 24 : index
    %c0_17 = arith.constant 0 : index
    %13 = vector.load %arg9[%c24, %c0_17] : memref<216x1024xbf16, #tpu.memory_space<vmem>>, vector<8x1024xbf16>
    tpu.vector_store %arg9[%c24, %c0_17], %12 {strides = array<i32>} : memref<216x1024xbf16, #tpu.memory_space<vmem>>, vector<8x1024xbf16>,
    %c0_18 = arith.constant 0 : index
    %c28 = arith.constant 28 : index
    %14 = vector.load %arg8[%c0_18, %c28] : memref<8x1280xbf16, #tpu.memory_space<vmem>>, vector<8x1024xbf16>
    %c32 = arith.constant 32 : index
    %c0_19 = arith.constant 0 : index
    %15 = vector.load %arg9[%c32, %c0_19] : memref<216x1024xbf16, #tpu.memory_space<vmem>>, vector<8x1024xbf16>
    tpu.vector_store %arg9[%c32, %c0_19], %14 {strides = array<i32>} : memref<216x1024xbf16, #tpu.memory_space<vmem>>, vector<8x1024xbf16>,
    %c0_20 = arith.constant 0 : index
    %c29 = arith.constant 29 : index
    %16 = vector.load %arg8[%c0_20, %c29] : memref<8x1280xbf16, #tpu.memory_space<vmem>>, vector<8x1024xbf16>
    %c40 = arith.constant 40 : index
    %c0_21 = arith.constant 0 : index
    %17 = vector.load %arg9[%c40, %c0_21] : memref<216x1024xbf16, #tpu.memory_space<vmem>>, vector<8x1024xbf16>
    tpu.vector_store %arg9[%c40, %c0_21], %16 {strides = array<i32>} : memref<216x1024xbf16, #tpu.memory_space<vmem>>, vector<8x1024xbf16>,
    %c0_22 = arith.constant 0 : index
    %c37 = arith.constant 37 : index
    %18 = vector.load %arg8[%c0_22, %c37] : memref<8x1280xbf16, #tpu.memory_space<vmem>>, vector<8x1024xbf16>
    %c48 = arith.constant 48 : index
    %c0_23 = arith.constant 0 : index
    %19 = vector.load %arg9[%c48, %c0_23] : memref<216x1024xbf16, #tpu.memory_space<vmem>>, vector<8x1024xbf16>
    tpu.vector_store %arg9[%c48, %c0_23], %18 {strides = array<i32>} : memref<216x1024xbf16, #tpu.memory_space<vmem>>, vector<8x1024xbf16>,
    %c0_24 = arith.constant 0 : index
    %c38 = arith.constant 38 : index
    %20 = vector.load %arg8[%c0_24, %c38] : memref<8x1280xbf16, #tpu.memory_space<vmem>>, vector<8x1024xbf16>
    %c56 = arith.constant 56 : index
    %c0_25 = arith.constant 0 : index
    %21 = vector.load %arg9[%c56, %c0_25] : memref<216x1024xbf16, #tpu.memory_space<vmem>>, vector<8x1024xbf16>
    tpu.vector_store %arg9[%c56, %c0_25], %20 {strides = array<i32>} : memref<216x1024xbf16, #tpu.memory_space<vmem>>, vector<8x1024xbf16>,
    %c0_26 = arith.constant 0 : index
    %c39 = arith.constant 39 : index
    %22 = vector.load %arg8[%c0_26, %c39] : memref<8x1280xbf16, #tpu.memory_space<vmem>>, vector<8x1024xbf16>
    %c64 = arith.constant 64 : index
    %c0_27 = arith.constant 0 : index
    %23 = vector.load %arg9[%c64, %c0_27] : memref<216x1024xbf16, #tpu.memory_space<vmem>>, vector<8x1024xbf16>
    tpu.vector_store %arg9[%c64, %c0_27], %22 {strides = array<i32>} : memref<216x1024xbf16, #tpu.memory_space<vmem>>, vector<8x1024xbf16>,
    %c0_28 = arith.constant 0 : index
    %c117 = arith.constant 117 : index
    %24 = vector.load %arg8[%c0_28, %c117] : memref<8x1280xbf16, #tpu.memory_space<vmem>>, vector<8x1024xbf16>
    %c72 = arith.constant 72 : index
    %c0_29 = arith.constant 0 : index
    %25 = vector.load %arg9[%c72, %c0_29] : memref<216x1024xbf16, #tpu.memory_space<vmem>>, vector<8x1024xbf16>
    tpu.vector_store %arg9[%c72, %c0_29], %24 {strides = array<i32>} : memref<216x1024xbf16, #tpu.memory_space<vmem>>, vector<8x1024xbf16>,
    %c0_30 = arith.constant 0 : index
    %c118 = arith.constant 118 : index
    %26 = vector.load %arg8[%c0_30, %c118] : memref<8x1280xbf16, #tpu.memory_space<vmem>>, vector<8x1024xbf16>
    %c80 = arith.constant 80 : index
    %c0_31 = arith.constant 0 : index
    %27 = vector.load %arg9[%c80, %c0_31] : memref<216x1024xbf16, #tpu.memory_space<vmem>>, vector<8x1024xbf16>
    tpu.vector_store %arg9[%c80, %c0_31], %26 {strides = array<i32>} : memref<216x1024xbf16, #tpu.memory_space<vmem>>, vector<8x1024xbf16>,
    %c0_32 = arith.constant 0 : index
    %c119 = arith.constant 119 : index
    %28 = vector.load %arg8[%c0_32, %c119] : memref<8x1280xbf16, #tpu.memory_space<vmem>>, vector<8x1024xbf16>
    %c88 = arith.constant 88 : index
    %c0_33 = arith.constant 0 : index
    %29 = vector.load %arg9[%c88, %c0_33] : memref<216x1024xbf16, #tpu.memory_space<vmem>>, vector<8x1024xbf16>
    tpu.vector_store %arg9[%c88, %c0_33], %28 {strides = array<i32>} : memref<216x1024xbf16, #tpu.memory_space<vmem>>, vector<8x1024xbf16>,
    %c0_34 = arith.constant 0 : index
    %c127 = arith.constant 127 : index
    %30 = vector.load %arg8[%c0_34, %c127] : memref<8x1280xbf16, #tpu.memory_space<vmem>>, vector<8x1024xbf16>
    %c96 = arith.constant 96 : index
    %c0_35 = arith.constant 0 : index
    %31 = vector.load %arg9[%c96, %c0_35] : memref<216x1024xbf16, #tpu.memory_space<vmem>>, vector<8x1024xbf16>
    tpu.vector_store %arg9[%c96, %c0_35], %30 {strides = array<i32>} : memref<216x1024xbf16, #tpu.memory_space<vmem>>, vector<8x1024xbf16>,
    %c0_36 = arith.constant 0 : index
    %c128_37 = arith.constant 128 : index
    %32 = vector.load %arg8[%c0_36, %c128_37] : memref<8x1280xbf16, #tpu.memory_space<vmem>>, vector<8x1024xbf16>
    %c104 = arith.constant 104 : index
    %c0_38 = arith.constant 0 : index
    %33 = vector.load %arg9[%c104, %c0_38] : memref<216x1024xbf16, #tpu.memory_space<vmem>>, vector<8x1024xbf16>
    tpu.vector_store %arg9[%c104, %c0_38], %32 {strides = array<i32>} : memref<216x1024xbf16, #tpu.memory_space<vmem>>, vector<8x1024xbf16>,
    %c0_39 = arith.constant 0 : index
    %c129 = arith.constant 129 : index
    %34 = vector.load %arg8[%c0_39, %c129] : memref<8x1280xbf16, #tpu.memory_space<vmem>>, vector<8x1024xbf16>
    %c112 = arith.constant 112 : index
    %c0_40 = arith.constant 0 : index
    %35 = vector.load %arg9[%c112, %c0_40] : memref<216x1024xbf16, #tpu.memory_space<vmem>>, vector<8x1024xbf16>
    tpu.vector_store %arg9[%c112, %c0_40], %34 {strides = array<i32>} : memref<216x1024xbf16, #tpu.memory_space<vmem>>, vector<8x1024xbf16>,
    %c0_41 = arith.constant 0 : index
    %c137 = arith.constant 137 : index
    %36 = vector.load %arg8[%c0_41, %c137] : memref<8x1280xbf16, #tpu.memory_space<vmem>>, vector<8x1024xbf16>
    %c120 = arith.constant 120 : index
    %c0_42 = arith.constant 0 : index
    %37 = vector.load %arg9[%c120, %c0_42] : memref<216x1024xbf16, #tpu.memory_space<vmem>>, vector<8x1024xbf16>
    tpu.vector_store %arg9[%c120, %c0_42], %36 {strides = array<i32>} : memref<216x1024xbf16, #tpu.memory_space<vmem>>, vector<8x1024xbf16>,
    %c0_43 = arith.constant 0 : index
    %c138 = arith.constant 138 : index
    %38 = vector.load %arg8[%c0_43, %c138] : memref<8x1280xbf16, #tpu.memory_space<vmem>>, vector<8x1024xbf16>
    %c128_44 = arith.constant 128 : index
    %c0_45 = arith.constant 0 : index
    %39 = vector.load %arg9[%c128_44, %c0_45] : memref<216x1024xbf16, #tpu.memory_space<vmem>>, vector<8x1024xbf16>
    tpu.vector_store %arg9[%c128_44, %c0_45], %38 {strides = array<i32>} : memref<216x1024xbf16, #tpu.memory_space<vmem>>, vector<8x1024xbf16>,
    %c0_46 = arith.constant 0 : index
    %c139 = arith.constant 139 : index
    %40 = vector.load %arg8[%c0_46, %c139] : memref<8x1280xbf16, #tpu.memory_space<vmem>>, vector<8x1024xbf16>
    %c136 = arith.constant 136 : index
    %c0_47 = arith.constant 0 : index
    %41 = vector.load %arg9[%c136, %c0_47] : memref<216x1024xbf16, #tpu.memory_space<vmem>>, vector<8x1024xbf16>
    tpu.vector_store %arg9[%c136, %c0_47], %40 {strides = array<i32>} : memref<216x1024xbf16, #tpu.memory_space<vmem>>, vector<8x1024xbf16>,
    %c0_48 = arith.constant 0 : index
    %c217 = arith.constant 217 : index
    %42 = vector.load %arg8[%c0_48, %c217] : memref<8x1280xbf16, #tpu.memory_space<vmem>>, vector<8x1024xbf16>
    %c144 = arith.constant 144 : index
    %c0_49 = arith.constant 0 : index
    %43 = vector.load %arg9[%c144, %c0_49] : memref<216x1024xbf16, #tpu.memory_space<vmem>>, vector<8x1024xbf16>
    tpu.vector_store %arg9[%c144, %c0_49], %42 {strides = array<i32>} : memref<216x1024xbf16, #tpu.memory_space<vmem>>, vector<8x1024xbf16>,
    %c0_50 = arith.constant 0 : index
    %c218 = arith.constant 218 : index
    %44 = vector.load %arg8[%c0_50, %c218] : memref<8x1280xbf16, #tpu.memory_space<vmem>>, vector<8x1024xbf16>
    %c152 = arith.constant 152 : index
    %c0_51 = arith.constant 0 : index
    %45 = vector.load %arg9[%c152, %c0_51] : memref<216x1024xbf16, #tpu.memory_space<vmem>>, vector<8x1024xbf16>
    tpu.vector_store %arg9[%c152, %c0_51], %44 {strides = array<i32>} : memref<216x1024xbf16, #tpu.memory_space<vmem>>, vector<8x1024xbf16>,
    %c0_52 = arith.constant 0 : index
    %c219 = arith.constant 219 : index
    %46 = vector.load %arg8[%c0_52, %c219] : memref<8x1280xbf16, #tpu.memory_space<vmem>>, vector<8x1024xbf16>
    %c160 = arith.constant 160 : index
    %c0_53 = arith.constant 0 : index
    %47 = vector.load %arg9[%c160, %c0_53] : memref<216x1024xbf16, #tpu.memory_space<vmem>>, vector<8x1024xbf16>
    tpu.vector_store %arg9[%c160, %c0_53], %46 {strides = array<i32>} : memref<216x1024xbf16, #tpu.memory_space<vmem>>, vector<8x1024xbf16>,
    %c0_54 = arith.constant 0 : index
    %c227 = arith.constant 227 : index
    %48 = vector.load %arg8[%c0_54, %c227] : memref<8x1280xbf16, #tpu.memory_space<vmem>>, vector<8x1024xbf16>
    %c168 = arith.constant 168 : index
    %c0_55 = arith.constant 0 : index
    %49 = vector.load %arg9[%c168, %c0_55] : memref<216x1024xbf16, #tpu.memory_space<vmem>>, vector<8x1024xbf16>
    tpu.vector_store %arg9[%c168, %c0_55], %48 {strides = array<i32>} : memref<216x1024xbf16, #tpu.memory_space<vmem>>, vector<8x1024xbf16>,
    %c0_56 = arith.constant 0 : index
    %c228 = arith.constant 228 : index
    %50 = vector.load %arg8[%c0_56, %c228] : memref<8x1280xbf16, #tpu.memory_space<vmem>>, vector<8x1024xbf16>
    %c176 = arith.constant 176 : index
    %c0_57 = arith.constant 0 : index
    %51 = vector.load %arg9[%c176, %c0_57] : memref<216x1024xbf16, #tpu.memory_space<vmem>>, vector<8x1024xbf16>
    tpu.vector_store %arg9[%c176, %c0_57], %50 {strides = array<i32>} : memref<216x1024xbf16, #tpu.memory_space<vmem>>, vector<8x1024xbf16>,
    %c0_58 = arith.constant 0 : index
    %c229 = arith.constant 229 : index
    %52 = vector.load %arg8[%c0_58, %c229] : memref<8x1280xbf16, #tpu.memory_space<vmem>>, vector<8x1024xbf16>
    %c184 = arith.constant 184 : index
    %c0_59 = arith.constant 0 : index
    %53 = vector.load %arg9[%c184, %c0_59] : memref<216x1024xbf16, #tpu.memory_space<vmem>>, vector<8x1024xbf16>
    tpu.vector_store %arg9[%c184, %c0_59], %52 {strides = array<i32>} : memref<216x1024xbf16, #tpu.memory_space<vmem>>, vector<8x1024xbf16>,
    %c0_60 = arith.constant 0 : index
    %c237 = arith.constant 237 : index
    %54 = vector.load %arg8[%c0_60, %c237] : memref<8x1280xbf16, #tpu.memory_space<vmem>>, vector<8x1024xbf16>
    %c192 = arith.constant 192 : index
    %c0_61 = arith.constant 0 : index
    %55 = vector.load %arg9[%c192, %c0_61] : memref<216x1024xbf16, #tpu.memory_space<vmem>>, vector<8x1024xbf16>
    tpu.vector_store %arg9[%c192, %c0_61], %54 {strides = array<i32>} : memref<216x1024xbf16, #tpu.memory_space<vmem>>, vector<8x1024xbf16>,
    %c0_62 = arith.constant 0 : index
    %c238 = arith.constant 238 : index
    %56 = vector.load %arg8[%c0_62, %c238] : memref<8x1280xbf16, #tpu.memory_space<vmem>>, vector<8x1024xbf16>
    %c200 = arith.constant 200 : index
    %c0_63 = arith.constant 0 : index
    %57 = vector.load %arg9[%c200, %c0_63] : memref<216x1024xbf16, #tpu.memory_space<vmem>>, vector<8x1024xbf16>
    tpu.vector_store %arg9[%c200, %c0_63], %56 {strides = array<i32>} : memref<216x1024xbf16, #tpu.memory_space<vmem>>, vector<8x1024xbf16>,
    %c0_64 = arith.constant 0 : index
    %c239 = arith.constant 239 : index
    %58 = vector.load %arg8[%c0_64, %c239] : memref<8x1280xbf16, #tpu.memory_space<vmem>>, vector<8x1024xbf16>
    %c208 = arith.constant 208 : index
    %c0_65 = arith.constant 0 : index
    %59 = vector.load %arg9[%c208, %c0_65] : memref<216x1024xbf16, #tpu.memory_space<vmem>>, vector<8x1024xbf16>
    tpu.vector_store %arg9[%c208, %c0_65], %58 {strides = array<i32>} : memref<216x1024xbf16, #tpu.memory_space<vmem>>, vector<8x1024xbf16>,
    %c0_66 = arith.constant 0 : index
    %c0_67 = arith.constant 0 : index
    %60 = vector.load %arg4[%c0_66, %c0_67] : memref<8x216xbf16, #tpu.memory_space<vmem>>, vector<8x216xbf16>
    %c0_68 = arith.constant 0 : index
    %c0_69 = arith.constant 0 : index
    %61 = vector.load %arg9[%c0_68, %c0_69] : memref<216x1024xbf16, #tpu.memory_space<vmem>>, vector<216x1024xbf16>
    %cst = arith.constant dense<0.000000e+00> : vector<8x1024xf32>
    %62 = tpu.matmul %60, %61, %cst {dimension_numbers = #tpu.dot_dimension_numbers<[1], [0], [0], [1], [0, 0, 1, 1], [], []>} : vector<8x216xbf16>, vector<216x1024xbf16>, vector<8x1024xf32> -> vector<8x1024xf32>
    %63 = arith.truncf %62 : vector<8x1024xf32> to vector<8x1024xbf16>
    %c0_70 = arith.constant 0 : index
    %c0_71 = arith.constant 0 : index
    %64 = vector.load %arg6[%c0_70, %c0_71] : memref<8x1024xbf16, #tpu.memory_space<vmem>>, vector<8x1024xbf16>
    tpu.vector_store %arg6[%c0_70, %c0_71], %63 {strides = array<i32>} : memref<8x1024xbf16, #tpu.memory_space<vmem>>, vector<8x1024xbf16>,
    %c0_72 = arith.constant 0 : index
    %c0_73 = arith.constant 0 : index
    %65 = vector.load %arg5[%c0_72, %c0_73] : memref<1x1024xbf16, #tpu.memory_space<vmem>>, vector<1x1024xbf16>
    %66 = arith.extf %65 : vector<1x1024xbf16> to vector<1x1024xf32>
    %67 = vector.broadcast %66 : vector<1x1024xf32> to vector<8x1024xf32>
    %68 = arith.mulf %62, %67 : vector<8x1024xf32>
    %cst_74 = arith.constant dense<0.000000e+00> : vector<8xf32>
    %69 = vector.multi_reduction <add>, %68, %cst_74 [1] : vector<8x1024xf32> to vector<8xf32>
    %70 = vector.shape_cast %69 : vector<8xf32> to vector<8x1xf32>
    %71 = vector.shape_cast %70 : vector<8x1xf32> to vector<8x1xf32>
    %72 = vector.broadcast %71 : vector<8x1xf32> to vector<8x128xf32>
    %c0_75 = arith.constant 0 : index
    %c0_76 = arith.constant 0 : index
    %73 = vector.load %arg7[%c0_75, %c0_76] : memref<16x128xf32, #tpu.memory_space<vmem>>, vector<8x128xf32>
    tpu.vector_store %arg7[%c0_75, %c0_76], %72 {strides = array<i32>} : memref<16x128xf32, #tpu.memory_space<vmem>>, vector<8x128xf32>,
    %74 = arith.mulf %68, %68 : vector<8x1024xf32>
    %cst_77 = arith.constant dense<0.000000e+00> : vector<8xf32>
    %75 = vector.multi_reduction <add>, %74, %cst_77 [1] : vector<8x1024xf32> to vector<8xf32>
    %76 = vector.shape_cast %75 : vector<8xf32> to vector<8x1xf32>
    %77 = vector.shape_cast %76 : vector<8x1xf32> to vector<8x1xf32>
    %78 = vector.broadcast %77 : vector<8x1xf32> to vector<8x128xf32>
    %c8_78 = arith.constant 8 : index
    %c0_79 = arith.constant 0 : index
    %79 = vector.load %arg7[%c8_78, %c0_79] : memref<16x128xf32, #tpu.memory_space<vmem>>, vector<8x128xf32>
    tpu.vector_store %arg7[%c8_78, %c0_79], %78 {strides = array<i32>} : memref<16x128xf32, #tpu.memory_space<vmem>>, vector<8x128xf32>,
    return
  }
  func.func @transform_0(%arg0: i32) -> (i32, i32) {
    %c8_i32 = arith.constant 8 : i32
    %0 = arith.muli %arg0, %c8_i32 : i32
    %c1_i32 = arith.constant 1 : i32
    %1 = arith.subi %0, %c1_i32 : i32
    %c0_i32 = arith.constant 0 : i32
    %2 = arith.maxsi %1, %c0_i32 : i32
    %c0_i32_0 = arith.constant 0 : i32
    %c0_i32_1 = arith.constant 0 : i32
    return %c0_i32_0, %2 : i32, i32
  }
  func.func @transform_1(%arg0: i32) -> (i32, i32) {
    %c0_i32 = arith.constant 0 : i32
    %c0_i32_0 = arith.constant 0 : i32
    return %c0_i32, %arg0 : i32, i32
  }
  func.func @transform_2(%arg0: i32) -> (i32, i32) {
    %c1_i32 = arith.constant 1 : i32
    %0 = arith.addi %arg0, %c1_i32 : i32
    %c8_i32 = arith.constant 8 : i32
    %1 = arith.muli %0, %c8_i32 : i32
    %c15_i32 = arith.constant 15 : i32
    %2 = arith.minsi %1, %c15_i32 : i32
    %c0_i32 = arith.constant 0 : i32
    %c0_i32_0 = arith.constant 0 : i32
    return %c0_i32, %2 : i32, i32
  }
  func.func @transform_3(%arg0: i32) -> (i32, i32) {
    %c0_i32 = arith.constant 0 : i32
    %c0_i32_0 = arith.constant 0 : i32
    %c0_i32_1 = arith.constant 0 : i32
    return %c0_i32, %c0_i32_0 : i32, i32
  }
  func.func @transform_4(%arg0: i32) -> (i32, i32) {
    %c0_i32 = arith.constant 0 : i32
    %c0_i32_0 = arith.constant 0 : i32
    return %c0_i32, %arg0 : i32, i32
  }
  func.func @transform_5(%arg0: i32) -> (i32, i32) {
    %c0_i32 = arith.constant 0 : i32
    %c0_i32_0 = arith.constant 0 : i32
    return %c0_i32, %arg0 : i32, i32
  }
  func.func @transform_6(%arg0: i32) -> (i32, i32) {
    %c0_i32 = arith.constant 0 : i32
    %c0_i32_0 = arith.constant 0 : i32
    return %c0_i32, %arg0 : i32, i32
  }
}

module attributes {stable_mosaic.version = 11 : i64} {
  func.func @bn_lrelu_kernel(%arg0: i32, %arg1: memref<8x1024xbf16, #tpu.memory_space<vmem>>, %arg2: memref<8x1xf32, #tpu.memory_space<vmem>>, %arg3: memref<8x1xf32, #tpu.memory_space<vmem>>, %arg4: memref<1x1024xbf16, #tpu.memory_space<vmem>>, %arg5: memref<8x1024xbf16, #tpu.memory_space<vmem>>) attributes {dimension_semantics = [#tpu.dimension_semantics<parallel>], iteration_bounds = array<i64: 2>, scalar_prefetch = 0 : i64, scratch_operands = 0 : i64, tpu.core_type = #tpu.core_type<tc>, window_params = [{transform_indices = @transform_0, window_bounds = array<i64: 8, 1024>}, {pipeline_mode = #tpu.pipeline_mode<synchronous>, transform_indices = @transform_1, window_bounds = array<i64: 8, 1>}, {pipeline_mode = #tpu.pipeline_mode<synchronous>, transform_indices = @transform_2, window_bounds = array<i64: 8, 1>}, {transform_indices = @transform_3, window_bounds = array<i64: 1, 1024>}, {transform_indices = @transform_4, window_bounds = array<i64: 8, 1024>}]} {
    %c0 = arith.constant 0 : index
    %c0_0 = arith.constant 0 : index
    %0 = vector.load %arg1[%c0, %c0_0] : memref<8x1024xbf16, #tpu.memory_space<vmem>>, vector<8x1024xbf16>
    %1 = arith.extf %0 : vector<8x1024xbf16> to vector<8x1024xf32>
    %c0_1 = arith.constant 0 : index
    %c0_2 = arith.constant 0 : index
    %2 = vector.load %arg2[%c0_1, %c0_2] : memref<8x1xf32, #tpu.memory_space<vmem>>, vector<8x1xf32>
    %3 = vector.broadcast %2 : vector<8x1xf32> to vector<8x1024xf32>
    %4 = arith.mulf %1, %3 : vector<8x1024xf32>
    %c0_3 = arith.constant 0 : index
    %c0_4 = arith.constant 0 : index
    %5 = vector.load %arg3[%c0_3, %c0_4] : memref<8x1xf32, #tpu.memory_space<vmem>>, vector<8x1xf32>
    %6 = vector.broadcast %5 : vector<8x1xf32> to vector<8x1024xf32>
    %7 = arith.addf %4, %6 : vector<8x1024xf32>
    %cst = arith.constant 0.000000e+00 : f32
    %8 = vector.broadcast %cst : f32 to vector<8x1024xf32>
    %9 = arith.cmpf oge, %7, %8 : vector<8x1024xf32>
    %cst_5 = arith.constant 0.00999999977 : f32
    %10 = vector.broadcast %cst_5 : f32 to vector<8x1024xf32>
    %11 = arith.mulf %10, %7 : vector<8x1024xf32>
    %12 = arith.select %9, %7, %11 : vector<8x1024xi1>, vector<8x1024xf32>
    %c0_6 = arith.constant 0 : index
    %c0_7 = arith.constant 0 : index
    %13 = vector.load %arg4[%c0_6, %c0_7] : memref<1x1024xbf16, #tpu.memory_space<vmem>>, vector<1x1024xbf16>
    %14 = arith.extf %13 : vector<1x1024xbf16> to vector<1x1024xf32>
    %15 = vector.broadcast %14 : vector<1x1024xf32> to vector<8x1024xf32>
    %16 = arith.mulf %12, %15 : vector<8x1024xf32>
    %17 = arith.truncf %16 : vector<8x1024xf32> to vector<8x1024xbf16>
    %c0_8 = arith.constant 0 : index
    %c0_9 = arith.constant 0 : index
    %18 = vector.load %arg5[%c0_8, %c0_9] : memref<8x1024xbf16, #tpu.memory_space<vmem>>, vector<8x1024xbf16>
    tpu.vector_store %arg5[%c0_8, %c0_9], %17 {strides = array<i32>} : memref<8x1024xbf16, #tpu.memory_space<vmem>>, vector<8x1024xbf16>,
    return
  }
  func.func @transform_0(%arg0: i32) -> (i32, i32) {
    %c0_i32 = arith.constant 0 : i32
    %c0_i32_0 = arith.constant 0 : i32
    return %c0_i32, %arg0 : i32, i32
  }
  func.func @transform_1(%arg0: i32) -> (i32, i32) {
    %c0_i32 = arith.constant 0 : i32
    %c0_i32_0 = arith.constant 0 : i32
    %c0_i32_1 = arith.constant 0 : i32
    return %c0_i32, %c0_i32_0 : i32, i32
  }
  func.func @transform_2(%arg0: i32) -> (i32, i32) {
    %c0_i32 = arith.constant 0 : i32
    %c0_i32_0 = arith.constant 0 : i32
    %c0_i32_1 = arith.constant 0 : i32
    return %c0_i32, %c0_i32_0 : i32, i32
  }
  func.func @transform_3(%arg0: i32) -> (i32, i32) {
    %c0_i32 = arith.constant 0 : i32
    %c0_i32_0 = arith.constant 0 : i32
    return %c0_i32, %arg0 : i32, i32
  }
  func.func @transform_4(%arg0: i32) -> (i32, i32) {
    %c0_i32 = arith.constant 0 : i32
    %c0_i32_0 = arith.constant 0 : i32
    return %c0_i32, %arg0 : i32, i32
  }
}

module attributes {stable_mosaic.version = 11 : i64} {
  func.func @bn_lrelu_kernel(%arg0: i32, %arg1: memref<8x1024xbf16, #tpu.memory_space<vmem>>, %arg2: memref<8x1xf32, #tpu.memory_space<vmem>>, %arg3: memref<8x1xf32, #tpu.memory_space<vmem>>, %arg4: memref<1x1024xbf16, #tpu.memory_space<vmem>>, %arg5: memref<8x1024xf32, #tpu.memory_space<vmem>>) attributes {dimension_semantics = [#tpu.dimension_semantics<parallel>], iteration_bounds = array<i64: 2>, scalar_prefetch = 0 : i64, scratch_operands = 0 : i64, tpu.core_type = #tpu.core_type<tc>, window_params = [{transform_indices = @transform_0, window_bounds = array<i64: 8, 1024>}, {pipeline_mode = #tpu.pipeline_mode<synchronous>, transform_indices = @transform_1, window_bounds = array<i64: 8, 1>}, {pipeline_mode = #tpu.pipeline_mode<synchronous>, transform_indices = @transform_2, window_bounds = array<i64: 8, 1>}, {transform_indices = @transform_3, window_bounds = array<i64: 1, 1024>}, {transform_indices = @transform_4, window_bounds = array<i64: 8, 1024>}]} {
    %c0 = arith.constant 0 : index
    %c0_0 = arith.constant 0 : index
    %0 = vector.load %arg1[%c0, %c0_0] : memref<8x1024xbf16, #tpu.memory_space<vmem>>, vector<8x1024xbf16>
    %1 = arith.extf %0 : vector<8x1024xbf16> to vector<8x1024xf32>
    %c0_1 = arith.constant 0 : index
    %c0_2 = arith.constant 0 : index
    %2 = vector.load %arg2[%c0_1, %c0_2] : memref<8x1xf32, #tpu.memory_space<vmem>>, vector<8x1xf32>
    %3 = vector.broadcast %2 : vector<8x1xf32> to vector<8x1024xf32>
    %4 = arith.mulf %1, %3 : vector<8x1024xf32>
    %c0_3 = arith.constant 0 : index
    %c0_4 = arith.constant 0 : index
    %5 = vector.load %arg3[%c0_3, %c0_4] : memref<8x1xf32, #tpu.memory_space<vmem>>, vector<8x1xf32>
    %6 = vector.broadcast %5 : vector<8x1xf32> to vector<8x1024xf32>
    %7 = arith.addf %4, %6 : vector<8x1024xf32>
    %cst = arith.constant 0.000000e+00 : f32
    %8 = vector.broadcast %cst : f32 to vector<8x1024xf32>
    %9 = arith.cmpf oge, %7, %8 : vector<8x1024xf32>
    %cst_5 = arith.constant 0.00999999977 : f32
    %10 = vector.broadcast %cst_5 : f32 to vector<8x1024xf32>
    %11 = arith.mulf %10, %7 : vector<8x1024xf32>
    %12 = arith.select %9, %7, %11 : vector<8x1024xi1>, vector<8x1024xf32>
    %c0_6 = arith.constant 0 : index
    %c0_7 = arith.constant 0 : index
    %13 = vector.load %arg4[%c0_6, %c0_7] : memref<1x1024xbf16, #tpu.memory_space<vmem>>, vector<1x1024xbf16>
    %14 = arith.extf %13 : vector<1x1024xbf16> to vector<1x1024xf32>
    %15 = vector.broadcast %14 : vector<1x1024xf32> to vector<8x1024xf32>
    %16 = arith.mulf %12, %15 : vector<8x1024xf32>
    %c0_8 = arith.constant 0 : index
    %c0_9 = arith.constant 0 : index
    %17 = vector.load %arg5[%c0_8, %c0_9] : memref<8x1024xf32, #tpu.memory_space<vmem>>, vector<8x1024xf32>
    tpu.vector_store %arg5[%c0_8, %c0_9], %16 {strides = array<i32>} : memref<8x1024xf32, #tpu.memory_space<vmem>>, vector<8x1024xf32>,
    return
  }
  func.func @transform_0(%arg0: i32) -> (i32, i32) {
    %c0_i32 = arith.constant 0 : i32
    %c0_i32_0 = arith.constant 0 : i32
    return %c0_i32, %arg0 : i32, i32
  }
  func.func @transform_1(%arg0: i32) -> (i32, i32) {
    %c0_i32 = arith.constant 0 : i32
    %c0_i32_0 = arith.constant 0 : i32
    %c0_i32_1 = arith.constant 0 : i32
    return %c0_i32, %c0_i32_0 : i32, i32
  }
  func.func @transform_2(%arg0: i32) -> (i32, i32) {
    %c0_i32 = arith.constant 0 : i32
    %c0_i32_0 = arith.constant 0 : i32
    %c0_i32_1 = arith.constant 0 : i32
    return %c0_i32, %c0_i32_0 : i32, i32
  }
  func.func @transform_3(%arg0: i32) -> (i32, i32) {
    %c0_i32 = arith.constant 0 : i32
    %c0_i32_0 = arith.constant 0 : i32
    return %c0_i32, %arg0 : i32, i32
  }
  func.func @transform_4(%arg0: i32) -> (i32, i32) {
    %c0_i32 = arith.constant 0 : i32
    %c0_i32_0 = arith.constant 0 : i32
    return %c0_i32, %arg0 : i32, i32
  }
}

</mosaic_0001>

<bundles_post_ra>
// kernel: convx2_forward.5
= control target key start
LH: loop header
LB: loop body
LE: loop exit
PB: predicated region body
PF: predicated region fallthrough
CT: control target
= control target key end

     0   :  { %s534_s15 = smov 0   ;;  %s600_s0 = inlined_call_operand.vmem [shape: bf16[8,2048], index: 0, kind: input, shape index: {}]   ;;  %s601_s1 = inlined_call_operand.vmem [shape: f32[8,1], index: 1, kind: input, shape index: {}]   ;;  %s602_s2 = inlined_call_operand.vmem [shape: f32[8,1], index: 2, kind: input, shape index: {}]   ;;  %s603_s3 = inlined_call_operand.vmem [shape: bf16[1,2048], index: 3, kind: input, shape index: {}]   ;;  %s604_s4 = inlined_call_operand.vmem [shape: bf16[8,2048], index: 4, kind: output, shape index: {}]  }
   0x1 LB: > { %s470_s16 = sadd.s32 4294967295, %s506_s15   ;;  %p474_p0 = scmp.ge.s32.totalorder %s506_s15, 1  ;;  %s506_s15 = sphi %s534_s15, %s14_s15  }
   0x2   : > { %p173_p1 = scmp.lt.s32.totalorder %s506_s15, 3 }
   0x4   : > { %p174_p2 = pnand %p474_p0, %p173_p1 }
   0x5   : > { %s475_s21 = sshll.u32 (!%p174_p2), %s470_s16, 3 }
   0x6   : > { %177 = sbr.rel (%p174_p2) target bundleno = 156 (0x9c), region = 36  ;;  %p204_p3 = scmp.lt.s32.totalorder (!%p174_p2), %s475_s21, 15 }
   0xb   : > { %v232_v0 = vld [vmem:[%s601_s1] sm:$0xff]  ;;  %v508_v1 = vmov 0   ;;  %v289_v3 = vlaneseq  ;;  %s606_s21 = smov (!%p204_p3, %s475_s21), 15 }
   0xc   : > { %499 = vset.pattern.permute.xlu0 %v508_v1  ;;  %v246_v2 = vld [vmem:[%s602_s2] sm:$0xff]  ;;  %s212_s24 = scalar_lea.vmem %s603_s3, %s606_s21  ;;  %s476_s25 = sshll.u32 %s606_s21, 2 }
   0xd   : > { %235 = vperm.xlu0 %499, %v232_v0   ;;  %v290_v4 = vshrl.u32 %v289_v3, 7  ;;  %v284_v5 = vld [vmem:[%s212_s24] sm:$0xff]  ;;  %s207_s28 = scalar_lea.vmem %s600_s0, %s476_s25  ;;  %s218_s5 = scalar_lea.vmem %s604_s4, %s476_s25 }
   0xe   : > { %v285_v8 = vunpack.c.l.bf16 %v284_v5  ;;  %v286_v11 = vunpack.c.h.bf16 %v284_v5  ;;  %v220_v12 = vld [vmem:[%s207_s28] sm:$0xff]  ;;  %v221_v13 = vld [vmem:[%s207_s28 + $0x8] sm:$0xff]  ;;  %v222_v14 = vld [vmem:[%s207_s28 + $0x10] sm:$0xff] }
   0xf   : > { %v555_v6 = vsub.s32 0, %v290_v4  ;;  %v295_v7 = vsub.s32 2, %v290_v4  ;;  %v299_v9 = vsub.s32 4, %v290_v4  ;;  %v303_v10 = vsub.s32 6, %v290_v4  ;;  %v223_v15 = vld [vmem:[%s207_s28 + $0x18] sm:$0xff] }
  0x10   : > { %v224_v22 = vunpack.c.l.bf16 %v220_v12  ;;  %v225_v23 = vunpack.c.h.bf16 %v220_v12  ;;  %v226_v24 = vunpack.c.l.bf16 %v221_v13  ;;  %v227_v25 = vunpack.c.h.bf16 %v221_v13 }
  0x11   : > { %249 = vperm.xlu0 %499, %v246_v2   ;;  %v292_v16 = vrot.slane %v285_v8, %v555_v6  ;;  %v563_v17 = vrot.slane %v285_v8, %v295_v7  ;;  %v565_v18 = vrot.slane %v285_v8, %v299_v9  ;;  %v567_v19 = vrot.slane %v285_v8, %v303_v10 }
  0x12   : > { %v308_v20 = vrot.slane %v286_v11, %v555_v6  ;;  %v570_v21 = vrot.slane %v286_v11, %v295_v7  ;;  %v228_v27 = vunpack.c.l.bf16 %v222_v14  ;;  %v229_v28 = vunpack.c.h.bf16 %v222_v14 }
  0x13   : > { %v230_v29 = vunpack.c.l.bf16 %v223_v15  ;;  %v231_v30 = vunpack.c.h.bf16 %v223_v15  ;;  %v316_v31 = vrot.slane %v286_v11, %v299_v9  ;;  %v320_v32 = vrot.slane %v286_v11, %v303_v10 }
  0x14   : > { %v332_v33 = vrot.slane %v292_v16, %v555_v6  ;;  %v336_v34 = vrot.slane %v563_v17, %v555_v6  ;;  %v340_v35 = vrot.slane %v565_v18, %v555_v6  ;;  %v344_v36 = vrot.slane %v567_v19, %v555_v6 }
  0x15   : > { %v348_v37 = vrot.slane %v308_v20, %v555_v6  ;;  %v352_v38 = vrot.slane %v570_v21, %v555_v6  ;;  %v356_v59 = vrot.slane %v316_v31, %v555_v6  ;;  %v360_v63 = vrot.slane %v320_v32, %v555_v6 }
  0x88   : > { %v236_v26 = vpop.permute.xlu0 %235 }
  0x89   : > { %v238_v39 = vmul.f32 %v236_v26, %v224_v22  ;;  %v239_v40 = vmul.f32 %v236_v26, %v225_v23  ;;  %v240_v41 = vmul.f32 %v236_v26, %v226_v24  ;;  %v241_v42 = vmul.f32 %v236_v26, %v227_v25 }
  0x8a   : > { %v242_v44 = vmul.f32 %v236_v26, %v228_v27  ;;  %v243_v45 = vmul.f32 %v236_v26, %v229_v28  ;;  %v244_v46 = vmul.f32 %v236_v26, %v230_v29  ;;  %v245_v47 = vmul.f32 %v236_v26, %v231_v30 }
  0x8c   : > { %v250_v43 = vpop.permute.xlu0 %249 }
  0x8d   : > { %v252_v48 = vadd.f32 %v250_v43, %v238_v39  ;;  %v253_v49 = vadd.f32 %v250_v43, %v239_v40  ;;  %v254_v50 = vadd.f32 %v250_v43, %v240_v41  ;;  %v255_v51 = vadd.f32 %v250_v43, %v241_v42 }
  0x8e   : > { %v256_v52 = vadd.f32 %v250_v43, %v242_v44  ;;  %v257_v53 = vadd.f32 %v250_v43, %v243_v45  ;;  %v258_v54 = vadd.f32 %v250_v43, %v244_v46  ;;  %v259_v55 = vadd.f32 %v250_v43, %v245_v47 }
  0x8f   : > { %vm260_vm0 = vcmp.ge.f32.partialorder %v252_v48, 0.0  ;;  %vm261_vm1 = vcmp.ge.f32.partialorder %v253_v49, 0.0  ;;  %vm262_vm2 = vcmp.ge.f32.partialorder %v254_v50, 0.0  ;;  %vm263_vm3 = vcmp.ge.f32.partialorder %v255_v51, 0.0 }
  0x90   : > { %vm264_vm4 = vcmp.ge.f32.partialorder %v256_v52, 0.0  ;;  %vm265_vm5 = vcmp.ge.f32.partialorder %v257_v53, 0.0  ;;  %vm266_vm6 = vcmp.ge.f32.partialorder %v258_v54, 0.0  ;;  %vm267_vm7 = vcmp.ge.f32.partialorder %v259_v55, 0.0 }
  0x91   : > { %v268_v56 = vmul.f32 0.01, %v252_v48  ;;  %v269_v57 = vmul.f32 0.01, %v253_v49  ;;  %v270_v58 = vmul.f32 0.01, %v254_v50 }
  0x92   : > { %v271_v60 = vmul.f32 0.01, %v255_v51  ;;  %v272_v61 = vmul.f32 0.01, %v256_v52  ;;  %v273_v62 = vmul.f32 0.01, %v257_v53 }
  0x93   : > { %v274_v0 = vmul.f32 0.01, %v258_v54  ;;  %v275_v1 = vmul.f32 0.01, %v259_v55  ;;  %v276_v2 = vsel %vm260_vm0, %v252_v48, %v268_v56  ;;  %v277_v3 = vsel %vm261_vm1, %v253_v49, %v269_v57 }
  0x94   : > { %v278_v4 = vsel %vm262_vm2, %v254_v50, %v270_v58  ;;  %v279_v5 = vsel %vm263_vm3, %v255_v51, %v271_v60  ;;  %v280_v7 = vsel %vm264_vm4, %v256_v52, %v272_v61  ;;  %v281_v8 = vsel %vm265_vm5, %v257_v53, %v273_v62 }
  0x95   : > { %v282_v9 = vsel %vm266_vm6, %v258_v54, %v274_v0  ;;  %v283_v10 = vsel %vm267_vm7, %v259_v55, %v275_v1  ;;  %v361_v11 = vmul.f32 %v332_v33, %v276_v2  ;;  %v362_v6 = vmul.f32 %v336_v34, %v277_v3 }
  0x96   : > { %v363_v12 = vmul.f32 %v340_v35, %v278_v4  ;;  %v364_v13 = vmul.f32 %v344_v36, %v279_v5  ;;  %v365_v14 = vmul.f32 %v348_v37, %v280_v7  ;;  %v366_v15 = vmul.f32 %v352_v38, %v281_v8 }
  0x97   : > { %v367_v16 = vmul.f32 %v356_v59, %v282_v9  ;;  %v368_v17 = vmul.f32 %v360_v63, %v283_v10  ;;  %v486_v18 = vpack.c.bf16 %v362_v6, %v361_v11 }
  0x98   : > { %v487_v19 = vpack.c.bf16 %v364_v13, %v363_v12  ;;  %v488_v20 = vpack.c.bf16 %v366_v15, %v365_v14 }
  0x99   : > { %v489_v21 = vpack.c.bf16 %v368_v17, %v367_v16  ;;  %401 = vst [vmem:[%s218_s5] sm:$0xff] %v486_v18 }
  0x9a   : > { %402 = vst [vmem:[%s218_s5 + $0x8] sm:$0xff] %v487_v19  ;;  %403 = vst [vmem:[%s218_s5 + $0x10] sm:$0xff] %v488_v20 }
  0x9b   : > { %404 = vst [vmem:[%s218_s5 + $0x18] sm:$0xff] %v489_v21 }
  0x9c PF: > { %s14_s15 = sadd.s32 1, %s506_s15  }
  0x9d   : > { %p11_p4 = scmp.ge.s32.totalorder %s14_s15, 4  }
  0x9f   :  { %13 = sbr.rel (!%p11_p4) target bundleno = 1 (0x1), region = 69 }

// kernel: convx2_forward.7
= control target key start
LH: loop header
LB: loop body
LE: loop exit
PB: predicated region body
PF: predicated region fallthrough
CT: control target
= control target key end

     0   :  { %s498_s15 = smov 0   ;;  %s561_s0 = inlined_call_operand.vmem [shape: bf16[8,2048], index: 0, kind: input, shape index: {}]   ;;  %s562_s1 = inlined_call_operand.vmem [shape: f32[8,1], index: 1, kind: input, shape index: {}]   ;;  %s563_s2 = inlined_call_operand.vmem [shape: f32[8,1], index: 2, kind: input, shape index: {}]   ;;  %s564_s3 = inlined_call_operand.vmem [shape: bf16[1,2048], index: 3, kind: input, shape index: {}]   ;;  %s565_s4 = inlined_call_operand.vmem [shape: f32[8,2048], index: 4, kind: output, shape index: {}]  }
   0x1 LB: > { %s442_s16 = sadd.s32 4294967295, %s470_s15   ;;  %p446_p0 = scmp.ge.s32.totalorder %s470_s15, 1  ;;  %s470_s15 = sphi %s498_s15, %s14_s15  }
   0x2   : > { %p173_p1 = scmp.lt.s32.totalorder %s470_s15, 3 }
   0x4   : > { %p174_p2 = pnand %p446_p0, %p173_p1 }
   0x5   : > { %s447_s21 = sshll.u32 (!%p174_p2), %s442_s16, 3 }
   0x6   : > { %177 = sbr.rel (%p174_p2) target bundleno = 155 (0x9b), region = 36  ;;  %p204_p3 = scmp.lt.s32.totalorder (!%p174_p2), %s447_s21, 15 }
   0xb   : > { %v232_v0 = vld [vmem:[%s562_s1] sm:$0xff]  ;;  %v472_v1 = vmov 0   ;;  %v289_v3 = vlaneseq  ;;  %s567_s21 = smov (!%p204_p3, %s447_s21), 15 }
   0xc   : > { %463 = vset.pattern.permute.xlu0 %v472_v1  ;;  %v246_v2 = vld [vmem:[%s563_s2] sm:$0xff]  ;;  %s212_s24 = scalar_lea.vmem %s564_s3, %s567_s21  ;;  %s448_s25 = sshll.u32 %s567_s21, 2 }
   0xd   : > { %235 = vperm.xlu0 %463, %v232_v0   ;;  %v290_v4 = vshrl.u32 %v289_v3, 7  ;;  %v284_v5 = vld [vmem:[%s212_s24] sm:$0xff]  ;;  %s207_s28 = scalar_lea.vmem %s561_s0, %s448_s25  ;;  %s451_s29 = sshll.u32 %s567_s21, 3 }
   0xe   : > { %v285_v8 = vunpack.c.l.bf16 %v284_v5  ;;  %v286_v11 = vunpack.c.h.bf16 %v284_v5  ;;  %v220_v12 = vld [vmem:[%s207_s28] sm:$0xff]  ;;  %v221_v13 = vld [vmem:[%s207_s28 + $0x8] sm:$0xff]  ;;  %v222_v14 = vld [vmem:[%s207_s28 + $0x10] sm:$0xff]  ;;  %s218_s6 = scalar_lea.vmem %s565_s4, %s451_s29 }
   0xf   : > { %v519_v6 = vsub.s32 0, %v290_v4  ;;  %v295_v7 = vsub.s32 2, %v290_v4  ;;  %v299_v9 = vsub.s32 4, %v290_v4  ;;  %v303_v10 = vsub.s32 6, %v290_v4  ;;  %v223_v15 = vld [vmem:[%s207_s28 + $0x18] sm:$0xff] }
  0x10   : > { %v224_v22 = vunpack.c.l.bf16 %v220_v12  ;;  %v225_v23 = vunpack.c.h.bf16 %v220_v12  ;;  %v226_v24 = vunpack.c.l.bf16 %v221_v13  ;;  %v227_v25 = vunpack.c.h.bf16 %v221_v13 }
  0x11   : > { %249 = vperm.xlu0 %463, %v246_v2   ;;  %v292_v16 = vrot.slane %v285_v8, %v519_v6  ;;  %v525_v17 = vrot.slane %v285_v8, %v295_v7  ;;  %v527_v18 = vrot.slane %v285_v8, %v299_v9  ;;  %v529_v19 = vrot.slane %v285_v8, %v303_v10 }
  0x12   : > { %v308_v20 = vrot.slane %v286_v11, %v519_v6  ;;  %v532_v21 = vrot.slane %v286_v11, %v295_v7  ;;  %v228_v27 = vunpack.c.l.bf16 %v222_v14  ;;  %v229_v28 = vunpack.c.h.bf16 %v222_v14 }
  0x13   : > { %v230_v29 = vunpack.c.l.bf16 %v223_v15  ;;  %v231_v30 = vunpack.c.h.bf16 %v223_v15  ;;  %v316_v31 = vrot.slane %v286_v11, %v299_v9  ;;  %v320_v32 = vrot.slane %v286_v11, %v303_v10 }
  0x14   : > { %v332_v33 = vrot.slane %v292_v16, %v519_v6  ;;  %v336_v34 = vrot.slane %v525_v17, %v519_v6  ;;  %v340_v35 = vrot.slane %v527_v18, %v519_v6  ;;  %v344_v36 = vrot.slane %v529_v19, %v519_v6 }
  0x15   : > { %v348_v37 = vrot.slane %v308_v20, %v519_v6  ;;  %v352_v38 = vrot.slane %v532_v21, %v519_v6  ;;  %v356_v59 = vrot.slane %v316_v31, %v519_v6  ;;  %v360_v63 = vrot.slane %v320_v32, %v519_v6 }
  0x88   : > { %v236_v26 = vpop.permute.xlu0 %235 }
  0x89   : > { %v238_v39 = vmul.f32 %v236_v26, %v224_v22  ;;  %v239_v40 = vmul.f32 %v236_v26, %v225_v23  ;;  %v240_v41 = vmul.f32 %v236_v26, %v226_v24  ;;  %v241_v42 = vmul.f32 %v236_v26, %v227_v25 }
  0x8a   : > { %v242_v44 = vmul.f32 %v236_v26, %v228_v27  ;;  %v243_v45 = vmul.f32 %v236_v26, %v229_v28  ;;  %v244_v46 = vmul.f32 %v236_v26, %v230_v29  ;;  %v245_v47 = vmul.f32 %v236_v26, %v231_v30 }
  0x8c   : > { %v250_v43 = vpop.permute.xlu0 %249 }
  0x8d   : > { %v252_v48 = vadd.f32 %v250_v43, %v238_v39  ;;  %v253_v49 = vadd.f32 %v250_v43, %v239_v40  ;;  %v254_v50 = vadd.f32 %v250_v43, %v240_v41  ;;  %v255_v51 = vadd.f32 %v250_v43, %v241_v42 }
  0x8e   : > { %v256_v52 = vadd.f32 %v250_v43, %v242_v44  ;;  %v257_v53 = vadd.f32 %v250_v43, %v243_v45  ;;  %v258_v54 = vadd.f32 %v250_v43, %v244_v46  ;;  %v259_v55 = vadd.f32 %v250_v43, %v245_v47 }
  0x8f   : > { %vm260_vm0 = vcmp.ge.f32.partialorder %v252_v48, 0.0  ;;  %vm261_vm1 = vcmp.ge.f32.partialorder %v253_v49, 0.0  ;;  %vm262_vm2 = vcmp.ge.f32.partialorder %v254_v50, 0.0  ;;  %vm263_vm3 = vcmp.ge.f32.partialorder %v255_v51, 0.0 }
  0x90   : > { %vm264_vm4 = vcmp.ge.f32.partialorder %v256_v52, 0.0  ;;  %vm265_vm5 = vcmp.ge.f32.partialorder %v257_v53, 0.0  ;;  %vm266_vm6 = vcmp.ge.f32.partialorder %v258_v54, 0.0  ;;  %vm267_vm7 = vcmp.ge.f32.partialorder %v259_v55, 0.0 }
  0x91   : > { %v268_v56 = vmul.f32 0.01, %v252_v48  ;;  %v269_v57 = vmul.f32 0.01, %v253_v49  ;;  %v270_v58 = vmul.f32 0.01, %v254_v50 }
  0x92   : > { %v271_v60 = vmul.f32 0.01, %v255_v51  ;;  %v272_v61 = vmul.f32 0.01, %v256_v52  ;;  %v273_v62 = vmul.f32 0.01, %v257_v53 }
  0x93   : > { %v274_v0 = vmul.f32 0.01, %v258_v54  ;;  %v275_v1 = vmul.f32 0.01, %v259_v55  ;;  %v276_v2 = vsel %vm260_vm0, %v252_v48, %v268_v56  ;;  %v277_v3 = vsel %vm261_vm1, %v253_v49, %v269_v57 }
  0x94   : > { %v278_v4 = vsel %vm262_vm2, %v254_v50, %v270_v58  ;;  %v279_v5 = vsel %vm263_vm3, %v255_v51, %v271_v60  ;;  %v280_v7 = vsel %vm264_vm4, %v256_v52, %v272_v61  ;;  %v281_v8 = vsel %vm265_vm5, %v257_v53, %v273_v62 }
  0x95   : > { %v282_v6 = vsel %vm266_vm6, %v258_v54, %v274_v0  ;;  %v283_v9 = vsel %vm267_vm7, %v259_v55, %v275_v1  ;;  %v361_v10 = vmul.f32 %v332_v33, %v276_v2  ;;  %v362_v11 = vmul.f32 %v336_v34, %v277_v3 }
  0x96   : > { %v363_v12 = vmul.f32 %v340_v35, %v278_v4  ;;  %v364_v13 = vmul.f32 %v344_v36, %v279_v5  ;;  %v365_v14 = vmul.f32 %v348_v37, %v280_v7  ;;  %v366_v15 = vmul.f32 %v352_v38, %v281_v8 }
  0x97   : > { %v367_v16 = vmul.f32 %v356_v59, %v282_v6  ;;  %v368_v17 = vmul.f32 %v360_v63, %v283_v9  ;;  %369 = vst [vmem:[%s218_s6] sm:$0xff] %v361_v10  ;;  %370 = vst [vmem:[%s218_s6 + $0x8] sm:$0xff] %v362_v11 }
  0x98   : > { %371 = vst [vmem:[%s218_s6 + $0x10] sm:$0xff] %v363_v12  ;;  %372 = vst [vmem:[%s218_s6 + $0x18] sm:$0xff] %v364_v13 }
  0x99   : > { %373 = vst [vmem:[%s218_s6 + $0x20] sm:$0xff] %v365_v14  ;;  %374 = vst [vmem:[%s218_s6 + $0x28] sm:$0xff] %v366_v15 }
  0x9a   : > { %375 = vst [vmem:[%s218_s6 + $0x30] sm:$0xff] %v367_v16  ;;  %376 = vst [vmem:[%s218_s6 + $0x38] sm:$0xff] %v368_v17 }
  0x9b PF: > { %s14_s15 = sadd.s32 1, %s470_s15  }
  0x9c   : > { %p11_p4 = scmp.ge.s32.totalorder %s14_s15, 4  }
  0x9e   :  { %13 = sbr.rel (!%p11_p4) target bundleno = 1 (0x1), region = 69 }

// kernel: convx2_forward.4
= control target key start
LH: loop header
LB: loop body
LE: loop exit
PB: predicated region body
PF: predicated region fallthrough
CT: control target
= control target key end

     0   :  { %s2957_s21 = smov 0   ;;  %s2959_s22 = smov 0   ;;  %s3827_s0 = inlined_call_operand.vmem [shape: bf16[8,2048], index: 0, kind: input, shape index: {}, may-alias: {0,1,2}]   ;;  %s3828_s1 = inlined_call_operand.vmem [shape: bf16[8,2048], index: 1, kind: input, shape index: {}, may-alias: {0,1,2}]   ;;  %s3829_s2 = inlined_call_operand.vmem [shape: bf16[8,2048], index: 2, kind: input, shape index: {}, may-alias: {0,1,2}]   ;;  %s3830_s3 = inlined_call_operand.vmem [shape: bf16[8,216], index: 3, kind: input, shape index: {}]   ;;  %s3831_s4 = inlined_call_operand.vmem [shape: bf16[1,2048], index: 4, kind: input, shape index: {}]   ;;  %s3832_s5 = inlined_call_operand.vmem [shape: bf16[8,2048], index: 5, kind: output, shape index: {0}]   ;;  %s3833_s6 = inlined_call_operand.vmem [shape: f32[16,256], index: 6, kind: output, shape index: {1}]  }
   0x1   :  { %s2961_s23 = smov 0  }
   0x2 LB: > { %s2645_s24 = sadd.s32 4294967295, %s2894_s23   ;;  %s2970_s25 = sadd.s32 1, %s2894_s23   ;;  %s2894_s23 = sphi %s2961_s23, %s3924_s23   ;;  %s2890_s22 = sphi %s2959_s22, %s3923_s22   ;;  %s2886_s21 = sphi %s2957_s21, %s3922_s21  }
   0x3   : > { %s188_s26 = ssub.s32 %s2894_s23, %s2970_s25  ;;  %s191_s27 = sadd.s32 1, %s2890_s22 }
   0x4   : > { %p189_p0 = scmp.eq.s32.totalorder %s188_s26, 0  ;;  %p201_p1 = scmp.ne.s32.totalorder %s2890_s22, %s2886_s21 }
   0x5   : > { %p202_p2 = scmp.eq.s32.totalorder %s2645_s24, 1  ;;  %p2655_p3 = scmp.ge.s32.totalorder %s2894_s23, 1 }
   0x6   : > { %s2977_s28 = scalar_select %p189_p0, %s2890_s22, %s191_s27  }
   0x7   : > { %p2979_p4 = por %p202_p2, %p201_p1  ;;  %p276_p5 = scmp.lt.s32.totalorder %s2894_s23, 3 }
   0x9   : > { %p277_p6 = pnand %p2655_p3, %p276_p5 }
   0xa   : > { %s2983_s30 = sshll.u32 (!%p277_p6), %s2645_s24, 3  ;;  %s2896_s13 = smov (!%p277_p6), 119  }
   0xb   : > { %280 = sbr.rel (%p277_p6) target bundleno = 750 (0x2ee), region = 40  ;;  %p343_p7 = scmp.lt.s32.totalorder (!%p277_p6), %s2983_s30, 15 }
   0xc   : > { %s2658_s7 = sadd.s32 (!%p277_p6), 4294967295, %s2983_s30  ;;  %s2897_s14 = smov (!%p277_p6), 127  }
   0xd   : > { %p332_p8 = scmp.gt.s32.totalorder (!%p277_p6), %s2658_s7, 0  ;;  %p2659_p9 = scmp.lt.s32.totalorder (!%p277_p6), %s2658_s7, 15 }
   0xe   : > { %s2898_s19 = smov (!%p277_p6), 1   ;;  %s2899_s20 = smov (!%p277_p6), 10  }
   0xf   : > { %s2814_s23 = sadd.s32 (!%p277_p6), 8, %s2983_s30  ;;  %s2900_s24 = smov (!%p277_p6), 9  }
  0x10   : > { %s2988_s8 = scalar_select %p343_p7, %s2983_s30, 15  ;;  %vm409_vm0 = vcmask 1043456   ;;  %vm965_vm1 = vcmask 1039360   ;;  %vm1007_vm2 = vcmask 973824   ;;  %vm915_vm3 = vcmask 7168   ;;  %v3180_v62 = vld [vmem:[%s3830_s3] sm:$0xff] }
  0x11   : > { %s3926_s7 = smov (!%p332_p8, %s2658_s7), 0  ;;  %p350_p10 = scmp.lt.s32.totalorder %s2814_s23, 15  ;;  %vm831_vm4 = vcmask 80896   ;;  %vm873_vm5 = vcmask 72704   ;;  %vm2140_vm6 = vcmask 719872   ;;  %vm747_vm7 = vcmask 728064  }
  0x12   : > { %s3834_s9 = sshll.u32 %s2988_s8, 2  ;;  %s3928_s7 = smov (!%p2659_p9, %s3926_s7), 15  ;;  %vm789_vm8 = vcmask 89088   ;;  %vm663_vm9 = vcmask 744448   ;;  %vm705_vm10 = vcmask 736256   ;;  %vm3857_vm11 = vcmask 818176  }
  0x13   : > { %s2996_s12 = scalar_lea.vmem %s3828_s1, %s3834_s9  ;;  %s2664_s15 = sshll.u32 %s3928_s7, 2  ;;  %vm3871_vm12 = vcmask 809984   ;;  %vm3858_vm13 = vcmask 891904   ;;  %vm3862_vm14 = vcmask 826368   ;;  %vm3859_vm15 = vcmask 908288  }
  0x14   : > { %v2999_v0 = vld [vmem:[%s2996_s12] sm:$0xff]  ;;  %v3002_v1 = vld [vmem:[%s2996_s12 + $0x8] sm:$0xff]  ;;  %v3005_v2 = vld [vmem:[%s2996_s12 + $0x10] sm:$0xff]  ;;  %s337_s18 = scalar_lea.vmem %s3827_s0, %s2664_s15  ;;  %s3930_s23 = smov (!%p350_p10, %s2814_s23), 15 }
  0x15   : > { %378 = vst [vmem:[#allocation2 + $0x4] sm:$0xff] %v2999_v0  ;;  %991 = vrot.lane.b32.xlu1 %v2999_v0, %s2896_s13  ;;  %949 = vrot.lane.b32.xlu0 %v2999_v0, %s2897_s14  ;;  %379 = vst [vmem:[#allocation2 + $0xc] sm:$0xff] %v3002_v1  ;;  %v372_v3 = vld [vmem:[%s337_s18] sm:$0xf]  ;;  %s3932_s23 = smov (!%p350_p10, %s3930_s23), 15  ;;  %s2901_s27 = smov 89  }
  0x16   : > { %380 = vst [vmem:[#allocation2 + $0x14] sm:$0xff] %v3005_v2  ;;  %373 = vst [vmem:[#allocation2] sm:$0xf] %v372_v3  ;;  %s2671_s26 = sshll.u32 %s3932_s23, 2  ;;  %v3037_v7 = vld [vmem:[%s2996_s12 + $0x18] sm:$0xff]  ;;  %s2902_s15 = smov 11  }
  0x17   : > { %s355_s11 = scalar_lea.vmem %s3829_s2, %s2671_s26  ;;  %381 = vst [vmem:[#allocation2 + $0x1c] sm:$0xff] %v3037_v7  ;;  %s2903_s16 = smov 91  }
  0x18   : > { %v382_v8 = vld [vmem:[%s355_s11] sm:$0xf]  ;;  %s2904_s12 = smov 90   ;;  %s2905_s17 = smov 100  }
  0x19   : > { %993 = vrot.lane.b32.xlu1 %v3002_v1, %s2896_s13  ;;  %951 = vrot.lane.b32.xlu0 %v3002_v1, %s2897_s14  ;;  %383 = vst [vmem:[#allocation2 + $0x24] sm:$0xf] %v382_v8  ;;  %s2906_s18 = smov 99   ;;  %s3835_s23 = smov 109  }
  0x1a   : > { %s3855_s26 = smov 101   ;;  %s3837_s7 = smov 111  }
  0x1b   : > { %s3839_s10 = smov 110   ;;  %s3841_s11 = smov 17  }
  0x1c   : > { %v890_v4 = vld [vmem:[#allocation2 + $0x8] sm:$0xff]  ;;  %s3845_s9 = smov 19  }
  0x1d   : > { %953 = vrot.lane.b32.xlu0 %v3005_v2, %s2897_s14  ;;  %901 = vrot.lane.b32.xlu1 %v890_v4, %s2898_s19  ;;  %v889_v5 = vld [vmem:[#allocation2] sm:$0xff]  ;;  %v891_v6 = vld [vmem:[#allocation2 + $0x10] sm:$0xff] }
  0x21   : > { %995 = vrot.lane.b32.xlu1 %v3005_v2, %s2896_s13  ;;  %899 = vrot.lane.b32.xlu0 %v889_v5, %s2898_s19 }
  0x25   : > { %817 = vrot.lane.b32.xlu1 %v890_v4, %s2899_s20  ;;  %815 = vrot.lane.b32.xlu0 %v889_v5, %s2899_s20 }
  0x29   : > { %859 = vrot.lane.b32.xlu1 %v890_v4, %s2900_s24  ;;  %857 = vrot.lane.b32.xlu0 %v889_v5, %s2900_s24 }
  0x2d   : > { %731 = vrot.lane.b32.xlu1 %v889_v5, %s2901_s27  ;;  %903 = vrot.lane.b32.xlu0 %v891_v6, %s2898_s19 }
  0x31   : > { %773 = vrot.lane.b32.xlu1 %v889_v5, %s2902_s15  ;;  %733 = vrot.lane.b32.xlu0 %v890_v4, %s2901_s27 }
  0x35   : > { %819 = vrot.lane.b32.xlu1 %v891_v6, %s2899_s20  ;;  %775 = vrot.lane.b32.xlu0 %v890_v4, %s2902_s15 }
  0x39   : > { %647 = vrot.lane.b32.xlu1 %v889_v5, %s2903_s16  ;;  %861 = vrot.lane.b32.xlu0 %v891_v6, %s2900_s24 }
  0x3d   : > { %689 = vrot.lane.b32.xlu1 %v889_v5, %s2904_s12  ;;  %649 = vrot.lane.b32.xlu0 %v890_v4, %s2903_s16 }
  0x41   : > { %735 = vrot.lane.b32.xlu1 %v891_v6, %s2901_s27  ;;  %691 = vrot.lane.b32.xlu0 %v890_v4, %s2904_s12 }
  0x45   : > { %563 = vrot.lane.b32.xlu1 %v889_v5, %s2905_s17  ;;  %777 = vrot.lane.b32.xlu0 %v891_v6, %s2902_s15 }
  0x49   : > { %605 = vrot.lane.b32.xlu1 %v889_v5, %s2906_s18  ;;  %565 = vrot.lane.b32.xlu0 %v890_v4, %s2905_s17 }
  0x4d   : > { %651 = vrot.lane.b32.xlu1 %v891_v6, %s2903_s16  ;;  %607 = vrot.lane.b32.xlu0 %v890_v4, %s2906_s18 }
  0x51   : > { %479 = vrot.lane.b32.xlu1 %v889_v5, %s3835_s23  ;;  %693 = vrot.lane.b32.xlu0 %v891_v6, %s2904_s12 }
  0x55   : > { %521 = vrot.lane.b32.xlu1 %v889_v5, %s3855_s26  ;;  %481 = vrot.lane.b32.xlu0 %v890_v4, %s3835_s23 }
  0x59   : > { %567 = vrot.lane.b32.xlu1 %v891_v6, %s2905_s17  ;;  %523 = vrot.lane.b32.xlu0 %v890_v4, %s3855_s26 }
  0x5d   : > { %394 = vrot.lane.b32.xlu1 %v889_v5, %s3837_s7  ;;  %609 = vrot.lane.b32.xlu0 %v891_v6, %s2906_s18 }
  0x61   : > { %437 = vrot.lane.b32.xlu1 %v889_v5, %s3839_s10  ;;  %396 = vrot.lane.b32.xlu0 %v890_v4, %s3837_s7  ;;  %v3187_v5 = vcombine.high %v3180_v62, %v3180_v62 }
  0x63   : > { %2790 = vmatprep.mubr.msk.bf16.mxu0 %vm2140_vm6, %v3187_v5  ;;  %2792 = vmatprep.mubr.msk.bf16.mxu1 %vm2140_vm6, %v3187_v5 }
  0x65   : > { %483 = vrot.lane.b32.xlu1 %v891_v6, %s3835_s23  ;;  %439 = vrot.lane.b32.xlu0 %v890_v4, %s3839_s10  ;;  %s3843_s23 = smov 18  }
  0x69   : > { %398 = vrot.lane.b32.xlu1 %v891_v6, %s3837_s7  ;;  %525 = vrot.lane.b32.xlu0 %v891_v6, %s3855_s26  ;;  %s3847_s7 = smov 28   ;;  %s363_s26 = scalar_lea.vmem %s3831_s4, %s2988_s8 }
  0x6d   : > { %1453 = vrot.lane.b32.xlu1 %v2999_v0, %s3841_s11  ;;  %441 = vrot.lane.b32.xlu0 %v891_v6, %s3839_s10  ;;  %s3853_s10 = smov 27  }
  0x71   : > { %1369 = vrot.lane.b32.xlu1 %v2999_v0, %s3845_s9  ;;  %1455 = vrot.lane.b32.xlu0 %v3002_v1, %s3841_s11 }
  0x75   : > { %1411 = vrot.lane.b32.xlu1 %v2999_v0, %s3843_s23  ;;  %1371 = vrot.lane.b32.xlu0 %v3002_v1, %s3845_s9 }
  0x79   : > { %1457 = vrot.lane.b32.xlu1 %v3005_v2, %s3841_s11  ;;  %1413 = vrot.lane.b32.xlu0 %v3002_v1, %s3843_s23  ;;  %s3851_s11 = smov 37  }
  0x7d   : > { %1287 = vrot.lane.b32.xlu1 %v3002_v1, %s3847_s7  ;;  %1285 = vrot.lane.b32.xlu0 %v2999_v0, %s3847_s7 }
  0x81   : > { %1329 = vrot.lane.b32.xlu1 %v3002_v1, %s3853_s10  ;;  %1327 = vrot.lane.b32.xlu0 %v2999_v0, %s3853_s10 }
  0x85   : > { %1415 = vrot.lane.b32.xlu1 %v3005_v2, %s3843_s23  ;;  %1373 = vrot.lane.b32.xlu0 %v3005_v2, %s3845_s9  ;;  %s3849_s23 = smov 29   ;;  %s2918_s9 = smov 39  }
  0x87   : > { %v992_v9 = vpop.permute.xlu1 %991  ;;  %v950_v10 = vpop.permute.xlu0 %949 }
  0x88   : > { %v1001_v13 = vrot.slane %v992_v9, 4  ;;  %v959_v14 = vrot.slane %v950_v10, 4 }
  0x89   : > { %1203 = vrot.lane.b32.xlu1 %v3002_v1, %s3851_s11  ;;  %1201 = vrot.lane.b32.xlu0 %v2999_v0, %s3851_s11 }
  0x8b   : > { %v994_v11 = vpop.permute.xlu1 %993  ;;  %v952_v12 = vpop.permute.xlu0 %951 }
  0x8c   : > { %v1002_v15 = vrot.slane %v994_v11, 4  ;;  %v960_v16 = vrot.slane %v952_v12, 4 }
  0x8d   : > { %1245 = vrot.lane.b32.xlu1 %v3002_v1, %s3849_s23  ;;  %1243 = vrot.lane.b32.xlu0 %v2999_v0, %s3849_s23 }
  0x8e   : > { %v964_v17 = vsel %vm409_vm0, %v959_v14, %v960_v16  ;;  %v1006_v18 = vsel %vm409_vm0, %v1001_v13, %v1002_v15 }
  0x8f   : > { %v3108_v19 = vpop.permute.xlu0 %953  ;;  %v3110_v20 = vpop.permute.xlu1 %901  ;;  %v966_v21 = vsel %vm965_vm1, %v950_v10, %v964_v17  ;;  %v1008_v22 = vsel %vm1007_vm2, %v992_v9, %v1006_v18 }
  0x90   : > { %v961_v23 = vrot.slane %v3108_v19, 4  ;;  %v2734_v24 = vcombine.high %v966_v21, %v1008_v22  ;;  %v2733_v25 = vcombine.low %v966_v21, %v1008_v22  ;;  %v910_v30 = vrot.slane %v3110_v20, 4 }
  0x91   : > { %1331 = vrot.lane.b32.xlu1 %v3005_v2, %s3853_s10  ;;  %1289 = vrot.lane.b32.xlu0 %v3005_v2, %s3847_s7  ;;  %s2919_s7 = smov 38  }
  0x92   : > { %2169 = vmatprep.subr.bf16.mxu0 %v2734_v24  ;;  %v967_v28 = vsel %vm409_vm0, %v960_v16, %v961_v23 }
  0x93   : > { %2170 = vmatpush1.bf16.msra.mxu0 %v2733_v25  ;;  %v3119_v26 = vpop.permute.xlu1 %995  ;;  %v900_v29 = vpop.permute.xlu0 %899  ;;  %v968_v34 = vsel %vm965_vm1, %v952_v12, %v967_v28 }
  0x94   : > { %v1003_v27 = vrot.slane %v3119_v26, 4  ;;  %v909_v31 = vrot.slane %v900_v29, 4 }
  0x95   : > { %1119 = vrot.lane.b32.xlu1 %v3002_v1, %s2918_s9  ;;  %1117 = vrot.lane.b32.xlu0 %v2999_v0, %s2918_s9 }
  0x96   : > { %v1009_v32 = vsel %vm409_vm0, %v1002_v15, %v1003_v27  ;;  %v914_v36 = vsel %vm409_vm0, %v909_v31, %v910_v30 }
  0x97   : > { %v3133_v33 = vpop.permute.xlu1 %817  ;;  %v1010_v35 = vsel %vm1007_vm2, %v994_v11, %v1009_v32  ;;  %v916_v39 = vsel %vm915_vm3, %v900_v29, %v914_v36  ;;  %v816_v40 = vpop.permute.xlu0 %815 }
  0x98   : > { %v2736_v37 = vcombine.high %v968_v34, %v1010_v35  ;;  %v2735_v38 = vcombine.low %v968_v34, %v1010_v35  ;;  %v826_v41 = vrot.slane %v3133_v33, 4  ;;  %v825_v42 = vrot.slane %v816_v40, 4  ;;  %v943_v34 = vld [vmem:[#allocation2 + $0x24] sm:$0xf] }
  0x99   : > { %1161 = vrot.lane.b32.xlu1 %v3002_v1, %s2919_s7  ;;  %v2726_v43 = vcombine.high %v916_v39, %v2999_v0  ;;  %v2725_v44 = vcombine.low %v916_v39, %v2999_v0  ;;  %1159 = vrot.lane.b32.xlu0 %v2999_v0, %s2919_s7 }
  0x9a   : > { %2210 = vmatprep.subr.bf16.mxu1 %v2736_v37  ;;  %v830_v48 = vsel %vm409_vm0, %v825_v42, %v826_v41  ;;  %v3241_v37 = vld [vmem:[#allocation2 + $0x18] sm:$0xff]  ;;  %v985_v42 = vld [vmem:[#allocation2 + $0x24] sm:$0xf] }
  0x9b   : > { %2211 = vmatpush1.bf16.msra.mxu1 %v2735_v38  ;;  %v3146_v45 = vpop.permute.xlu1 %859  ;;  %2171 = vmatprep.subr.bf16.mxu0 %v2726_v43  ;;  %v858_v47 = vpop.permute.xlu0 %857  ;;  %v832_v52 = vsel %vm831_vm4, %v816_v40, %v830_v48 }
  0x9c   : > { %v868_v46 = vrot.slane %v3146_v45, 4  ;;  %2172 = vmatpush1.bf16.msra.mxu0 %v2725_v44  ;;  %v867_v49 = vrot.slane %v858_v47, 4 }
  0x9d   : > { %1247 = vrot.lane.b32.xlu1 %v3005_v2, %s3849_s23  ;;  %1205 = vrot.lane.b32.xlu0 %v3005_v2, %s3851_s11  ;;  %s2920_s23 = smov 118   ;;  %s2921_s11 = smov 117  }
  0x9e   : > { %v872_v51 = vsel %vm409_vm0, %v867_v49, %v868_v46 }
  0x9f   : > { %v732_v50 = vpop.permute.xlu1 %731  ;;  %v874_v53 = vsel %vm873_vm5, %v858_v47, %v872_v51  ;;  %v3161_v54 = vpop.permute.xlu0 %903 }
  0xa0   : > { %v911_v55 = vrot.slane %v3161_v54, 4  ;;  %v2718_v56 = vcombine.high %v832_v52, %v874_v53  ;;  %v2717_v57 = vcombine.low %v832_v52, %v874_v53  ;;  %v741_v8 = vrot.slane %v732_v50, 4 }
  0xa1   : > { %1035 = vrot.lane.b32.xlu1 %v3002_v1, %s2920_s23  ;;  %1033 = vrot.lane.b32.xlu0 %v2999_v0, %s2920_s23 }
  0xa2   : > { %2173 = vmatprep.subr.bf16.mxu0 %v2718_v56  ;;  %v917_v59 = vsel %vm409_vm0, %v910_v30, %v911_v55 }
  0xa3   : > { %v774_v58 = vpop.permute.xlu1 %773  ;;  %2174 = vmatpush1.bf16.msra.mxu0 %v2717_v57  ;;  %v3171_v60 = vpop.permute.xlu0 %733  ;;  %v918_v61 = vsel %vm915_vm3, %v3110_v20, %v917_v59 }
  0xa4   : > { %v742_v63 = vrot.slane %v3171_v60, 4  ;;  %v2728_v3 = vcombine.high %v918_v61, %v3002_v1  ;;  %v2727_v4 = vcombine.low %v918_v61, %v3002_v1 }
  0xa5   : > { %1077 = vrot.lane.b32.xlu1 %v3002_v1, %s2921_s11  ;;  %1075 = vrot.lane.b32.xlu0 %v2999_v0, %s2921_s11  ;;  %v783_v1 = vrot.slane %v774_v58, 4 }
  0xa6   : > { %2212 = vmatprep.subr.bf16.mxu1 %v2728_v3  ;;  %v746_v11 = vsel %vm409_vm0, %v741_v8, %v742_v63 }
  0xa7   : > { %v3191_v6 = vpop.permute.xlu1 %819  ;;  %2213 = vmatpush1.bf16.msra.mxu1 %v2727_v4  ;;  %v3195_v9 = vpop.permute.xlu0 %775  ;;  %v748_v15 = vsel %vm747_vm7, %v732_v50, %v746_v11  ;;  %v893_v50 = vld [vmem:[#allocation2 + $0x20] sm:$0xf] }
  0xa8   : > { %v784_v10 = vrot.slane %v3195_v9, 4  ;;  %v827_v0 = vrot.slane %v3191_v6, 4 }
  0xa9   : > { %1163 = vrot.lane.b32.xlu1 %v3005_v2, %s2919_s7  ;;  %1121 = vrot.lane.b32.xlu0 %v3005_v2, %s2918_s9 }
  0xaa   : > { %v788_v13 = vsel %vm409_vm0, %v783_v1, %v784_v10  ;;  %v833_v21 = vsel %vm409_vm0, %v826_v41, %v827_v0 }
  0xab   : > { %v648_v12 = vpop.permute.xlu1 %647  ;;  %v3209_v14 = vpop.permute.xlu0 %861  ;;  %v790_v16 = vsel %vm789_vm8, %v774_v58, %v788_v13  ;;  %v834_v28 = vsel %vm831_vm4, %v3133_v33, %v833_v21  ;;  %v809_v13 = vld [vmem:[#allocation2 + $0x20] sm:$0xf] }
  0xac   : > { %v869_v17 = vrot.slane %v3209_v14, 4  ;;  %v2710_v18 = vcombine.high %v748_v15, %v790_v16  ;;  %v2709_v20 = vcombine.low %v748_v15, %v790_v16  ;;  %v657_v36 = vrot.slane %v648_v12, 4 }
  0xad   : > { %997 = vrot.lane.b32.xlu1 %v3037_v7, %s2896_s13  ;;  %955 = vrot.lane.b32.xlu0 %v3037_v7, %s2897_s14 }
  0xae   : > { %2175 = vmatprep.subr.bf16.mxu0 %v2710_v18  ;;  %v875_v24 = vsel %vm409_vm0, %v868_v46, %v869_v17 }
  0xaf   : > { %v690_v22 = vpop.permute.xlu1 %689  ;;  %v3228_v25 = vpop.permute.xlu0 %649  ;;  %2176 = vmatpush1.bf16.msra.mxu0 %v2709_v20  ;;  %v876_v29 = vsel %vm873_vm5, %v3146_v45, %v875_v24 }
  0xb0   : > { %v658_v30 = vrot.slane %v3228_v25, 4  ;;  %v2720_v31 = vcombine.high %v834_v28, %v876_v29  ;;  %v2719_v32 = vcombine.low %v834_v28, %v876_v29  ;;  %v699_v33 = vrot.slane %v690_v22, 4 }
  0xb1   : > { %1079 = vrot.lane.b32.xlu1 %v3005_v2, %s2921_s11  ;;  %1037 = vrot.lane.b32.xlu0 %v3005_v2, %s2920_s23 }
  0xb2   : > { %2214 = vmatprep.subr.bf16.mxu1 %v2720_v31  ;;  %v662_v2 = vsel %vm409_vm0, %v657_v36, %v658_v30 }
  0xb3   : > { %v3239_v35 = vpop.permute.xlu1 %735  ;;  %v3243_v38 = vpop.permute.xlu0 %691  ;;  %2215 = vmatpush1.bf16.msra.mxu1 %v2719_v32  ;;  %v664_v45 = vsel %vm663_vm9, %v648_v12, %v662_v2 }
  0xb4   : > { %v700_v39 = vrot.slane %v3243_v38, 4  ;;  %v743_v40 = vrot.slane %v3239_v35, 4 }
  0xb5   : > { %957 = vrot.lane.b32.xlu1 %v943_v34, %s2897_s14  ;;  %905 = vrot.lane.b32.xlu0 %v3241_v37, %s2898_s19  ;;  %s3879_s14 = smov 109  }
  0xb6   : > { %v704_v43 = vsel %vm409_vm0, %v699_v33, %v700_v39  ;;  %v749_v51 = vsel %vm409_vm0, %v742_v63, %v743_v40 }
  0xb7   : > { %v564_v41 = vpop.permute.xlu1 %563  ;;  %v3254_v44 = vpop.permute.xlu0 %777  ;;  %v706_v46 = vsel %vm705_vm10, %v690_v22, %v704_v43  ;;  %v750_v57 = vsel %vm747_vm7, %v3171_v60, %v749_v51  ;;  %v725_v43 = vld [vmem:[#allocation2 + $0x20] sm:$0xf] }
  0xb8   : > { %v785_v47 = vrot.slane %v3254_v44, 4  ;;  %v2702_v48 = vcombine.high %v664_v45, %v706_v46  ;;  %v2701_v49 = vcombine.low %v664_v45, %v706_v46  ;;  %v573_v4 = vrot.slane %v564_v41, 4 }
  0xb9   : > { %821 = vrot.lane.b32.xlu1 %v3241_v37, %s2899_s20  ;;  %999 = vrot.lane.b32.xlu0 %v985_v42, %s2896_s13  ;;  %s3878_s13 = smov 101  }
  0xba   : > { %2177 = vmatprep.subr.bf16.mxu0 %v2702_v48  ;;  %v791_v53 = vsel %vm409_vm0, %v784_v10, %v785_v47  ;;  %v851_v10 = vld [vmem:[#allocation2 + $0x20] sm:$0xf] }
  0xbb   : > { %v606_v52 = vpop.permute.xlu1 %605  ;;  %v3270_v56 = vpop.permute.xlu0 %565  ;;  %2178 = vmatpush1.bf16.msra.mxu0 %v2701_v49  ;;  %v792_v58 = vsel %vm789_vm8, %v3195_v9, %v791_v53 }
  0xbc   : > { %v574_v59 = vrot.slane %v3270_v56, 4  ;;  %v2712_v61 = vcombine.high %v750_v57, %v792_v58  ;;  %v2711_v63 = vcombine.low %v750_v57, %v792_v58  ;;  %v615_v60 = vrot.slane %v606_v52, 4 }
  0xbd   : > { %907 = vrot.lane.b32.xlu1 %v893_v50, %s2898_s19  ;;  %863 = vrot.lane.b32.xlu0 %v3241_v37, %s2900_s24  ;;  %s3880_s19 = smov 110  }
  0xbe   : > { %2216 = vmatprep.subr.bf16.mxu1 %v2712_v61  ;;  %v578_v11 = vsel %vm409_vm0, %v573_v4, %v574_v59  ;;  %v683_v4 = vld [vmem:[#allocation2 + $0x20] sm:$0xf] }
  0xbf   : > { %v3280_v3 = vpop.permute.xlu1 %651  ;;  %v3282_v8 = vpop.permute.xlu0 %607  ;;  %2217 = vmatpush1.bf16.msra.mxu1 %v2711_v63  ;;  %v580_v18 = vsel %vm3857_vm11, %v564_v41, %v578_v11  ;;  %v767_v41 = vld [vmem:[#allocation2 + $0x20] sm:$0xf] }
  0xc0   : > { %v616_v9 = vrot.slane %v3282_v8, 4  ;;  %v659_v1 = vrot.slane %v3280_v3, 4  ;;  %v641_v11 = vld [vmem:[#allocation2 + $0x20] sm:$0xf] }
  0xc1   : > { %779 = vrot.lane.b32.xlu1 %v3241_v37, %s2902_s15  ;;  %737 = vrot.lane.b32.xlu0 %v3241_v37, %s2901_s27 }
  0xc2   : > { %v620_v15 = vsel %vm409_vm0, %v615_v60, %v616_v9  ;;  %v665_v28 = vsel %vm409_vm0, %v658_v30, %v659_v1 }
  0xc3   : > { %v480_v12 = vpop.permute.xlu1 %479  ;;  %v3294_v16 = vpop.permute.xlu0 %693  ;;  %v622_v20 = vsel %vm3871_vm12, %v606_v52, %v620_v15  ;;  %v666_v34 = vsel %vm663_vm9, %v3228_v25, %v665_v28 }
  0xc4   : > { %v701_v21 = vrot.slane %v3294_v16, 4  ;;  %v2694_v22 = vcombine.high %v580_v18, %v622_v20  ;;  %v2693_v24 = vcombine.low %v580_v18, %v622_v20  ;;  %v489_v42 = vrot.slane %v480_v12, 4 }
  0xc5   : > { %865 = vrot.lane.b32.xlu1 %v851_v10, %s2900_s24  ;;  %823 = vrot.lane.b32.xlu0 %v809_v13, %s2899_s20  ;;  %s3881_s20 = smov 111   ;;  %s3882_s24 = smov 19  }
  0xc6   : > { %2179 = vmatprep.subr.bf16.mxu0 %v2694_v22  ;;  %v707_v31 = vsel %vm409_vm0, %v700_v39, %v701_v21 }
  0xc7   : > { %v522_v29 = vpop.permute.xlu1 %521  ;;  %v3309_v32 = vpop.permute.xlu0 %481  ;;  %2180 = vmatpush1.bf16.msra.mxu0 %v2693_v24  ;;  %v708_v30 = vsel %vm705_vm10, %v3243_v38, %v707_v31  ;;  %v599_v31 = vld [vmem:[#allocation2 + $0x20] sm:$0xf] }
  0xc8   : > { %v490_v36 = vrot.slane %v3309_v32, 4  ;;  %v2704_v33 = vcombine.high %v666_v34, %v708_v30  ;;  %v2703_v2 = vcombine.low %v666_v34, %v708_v30  ;;  %v531_v25 = vrot.slane %v522_v29, 4 }
  0xc9   : > { %695 = vrot.lane.b32.xlu1 %v3241_v37, %s2904_s12  ;;  %653 = vrot.lane.b32.xlu0 %v3241_v37, %s2903_s16 }
  0xca   : > { %2218 = vmatprep.subr.bf16.mxu1 %v2704_v33  ;;  %v494_v48 = vsel %vm409_vm0, %v489_v42, %v490_v36  ;;  %v557_v33 = vld [vmem:[#allocation2 + $0x20] sm:$0xf] }
  0xcb   : > { %v3320_v39 = vpop.permute.xlu1 %567  ;;  %v3322_v45 = vpop.permute.xlu0 %523  ;;  %2219 = vmatpush1.bf16.msra.mxu1 %v2703_v2  ;;  %v496_v52 = vsel %vm3858_vm13, %v480_v12, %v494_v48 }
  0xcc   : > { %v532_v38 = vrot.slane %v3322_v45, 4  ;;  %v575_v46 = vrot.slane %v3320_v39, 4 }
  0xcd   : > { %781 = vrot.lane.b32.xlu1 %v767_v41, %s2902_s15  ;;  %739 = vrot.lane.b32.xlu0 %v725_v43, %s2901_s27  ;;  %s3883_s27 = smov 17   ;;  %s3884_s15 = smov 18  }
  0xce   : > { %v536_v50 = vsel %vm409_vm0, %v531_v25, %v532_v38  ;;  %v581_v57 = vsel %vm409_vm0, %v574_v59, %v575_v46 }
  0xcf   : > { %v395_v49 = vpop.permute.xlu1 %394  ;;  %v3330_v51 = vpop.permute.xlu0 %609  ;;  %v538_v53 = vsel %vm3862_vm14, %v522_v29, %v536_v50  ;;  %v582_v59 = vsel %vm3857_vm11, %v3270_v56, %v581_v57  ;;  %vm3860_vm11 = vcmask 900096  }
  0xd0   : > { %v617_v58 = vrot.slane %v3330_v51, 4  ;;  %v2686_v61 = vcombine.high %v496_v52, %v538_v53  ;;  %v2685_v63 = vcombine.low %v496_v52, %v538_v53 }
  0xd1   : > { %611 = vrot.lane.b32.xlu1 %v3241_v37, %s2906_s18  ;;  %569 = vrot.lane.b32.xlu0 %v3241_v37, %s2905_s17 }
  0xd2   : > { %v623_v10 = vsel %vm409_vm0, %v616_v9, %v617_v58  ;;  %2181 = vmatprep.subr.bf16.mxu0 %v2686_v61  ;;  %v404_v9 = vrot.slane %v395_v49, 4 }
  0xd3   : > { %v438_v60 = vpop.permute.xlu1 %437  ;;  %v397_v12 = vpop.permute.xlu0 %396  ;;  %2182 = vmatpush1.bf16.msra.mxu0 %v2685_v63  ;;  %v624_v13 = vsel %vm3871_vm12, %v3282_v8, %v623_v10  ;;  %v515_v10 = vld [vmem:[#allocation2 + $0x20] sm:$0xf]  ;;  %vm1091_vm12 = vcmask 957440  }
  0xd4   : > { %v405_v15 = vrot.slane %v397_v12, 4  ;;  %v2696_v18 = vcombine.high %v582_v59, %v624_v13  ;;  %v2695_v20 = vcombine.low %v582_v59, %v624_v13  ;;  %v447_v8 = vrot.slane %v438_v60, 4  ;;  %v473_v59 = vld [vmem:[#allocation2 + $0x20] sm:$0xf] }
  0xd5   : > { %697 = vrot.lane.b32.xlu1 %v683_v4, %s2904_s12  ;;  %655 = vrot.lane.b32.xlu0 %v641_v11, %s2903_s16  ;;  %s3885_s16 = smov 27   ;;  %s3886_s12 = smov 28  }
  0xd6   : > { %2220 = vmatprep.subr.bf16.mxu1 %v2696_v18  ;;  %v410_v56 = vsel %vm409_vm0, %v404_v9, %v405_v15 }
  0xd7   : > { %v3353_v22 = vpop.permute.xlu1 %483  ;;  %v440_v24 = vpop.permute.xlu0 %439  ;;  %2221 = vmatpush1.bf16.msra.mxu1 %v2695_v20  ;;  %v412_v42 = vsel %vm3859_vm15, %v395_v49, %v410_v56  ;;  %v431_v56 = vld [vmem:[#allocation2 + $0x20] sm:$0xf] }
  0xd8   : > { %v491_v28 = vrot.slane %v3353_v22, 4  ;;  %v448_v29 = vrot.slane %v440_v24, 4 }
  0xd9   : > { %527 = vrot.lane.b32.xlu1 %v3241_v37, %s3878_s13  ;;  %485 = vrot.lane.b32.xlu0 %v3241_v37, %s3879_s14 }
  0xda   : > { %v452_v30 = vsel %vm409_vm0, %v447_v8, %v448_v29  ;;  %v497_v2 = vsel %vm409_vm0, %v490_v36, %v491_v28 }
  0xdb   : > { %v3361_v34 = vpop.permute.xlu1 %398  ;;  %v3367_v41 = vpop.permute.xlu0 %525  ;;  %v454_v43 = vsel %vm3860_vm11, %v438_v60, %v452_v30  ;;  %v498_v49 = vsel %vm3858_vm13, %v3309_v32, %v497_v2  ;;  %vm3861_vm13 = vcmask 138240  }
  0xdc   : > { %v533_v25 = vrot.slane %v3367_v41, 4  ;;  %v406_v48 = vrot.slane %v3361_v34, 4  ;;  %v2678_v50 = vcombine.high %v412_v42, %v454_v43  ;;  %v2677_v52 = vcombine.low %v412_v42, %v454_v43 }
  0xdd   : > { %613 = vrot.lane.b32.xlu1 %v599_v31, %s2906_s18  ;;  %571 = vrot.lane.b32.xlu0 %v557_v33, %s2905_s17  ;;  %v388_v31 = vld [vmem:[#allocation2 + $0x20] sm:$0xf]  ;;  %s3887_s17 = smov 29   ;;  %s3888_s18 = smov 37  }
  0xde   : > { %v539_v36 = vsel %vm409_vm0, %v532_v38, %v533_v25  ;;  %2183 = vmatprep.subr.bf16.mxu0 %v2678_v50  ;;  %v413_v63 = vsel %vm409_vm0, %v405_v15, %v406_v48 }
  0xdf   : > { %v1454_v53 = vpop.permute.xlu1 %1453  ;;  %v3378_v57 = vpop.permute.xlu0 %441  ;;  %2184 = vmatpush1.bf16.msra.mxu0 %v2677_v52  ;;  %v540_v61 = vsel %vm3862_vm14, %v3322_v45, %v539_v36  ;;  %v414_v13 = vsel %vm3859_vm15, %v397_v12, %v413_v63  ;;  %vm3864_vm15 = vcmask 154624   ;;  %vm3866_vm14 = vcmask 220160  }
  0xe0   : > { %v449_v4 = vrot.slane %v3378_v57, 4  ;;  %v2688_v38 = vcombine.high %v498_v49, %v540_v61  ;;  %v2687_v60 = vcombine.low %v498_v49, %v540_v61  ;;  %v1463_v18 = vrot.slane %v1454_v53, 4 }
  0xe1   : > { %443 = vrot.lane.b32.xlu1 %v3241_v37, %s3880_s19  ;;  %400 = vrot.lane.b32.xlu0 %v3241_v37, %s3881_s20 }
  0xe2   : > { %v455_v32 = vsel %vm409_vm0, %v448_v29, %v449_v4  ;;  %2222 = vmatprep.subr.bf16.mxu1 %v2688_v38  ;;  %v1447_v38 = vld [vmem:[#allocation2 + $0x24] sm:$0xf] }
  0xe3   : > { %v1370_v11 = vpop.permute.xlu1 %1369  ;;  %v1456_v45 = vpop.permute.xlu0 %1455  ;;  %2223 = vmatpush1.bf16.msra.mxu1 %v2687_v60  ;;  %v456_v15 = vsel %vm3860_vm11, %v440_v24, %v455_v32  ;;  %vm3863_vm11 = vcmask 146432  }
  0xe4   : > { %v1464_v20 = vrot.slane %v1456_v45, 4  ;;  %v2680_v9 = vcombine.high %v414_v13, %v456_v15  ;;  %v2679_v37 = vcombine.low %v414_v13, %v456_v15  ;;  %v1379_v43 = vrot.slane %v1370_v11, 4 }
  0xe5   : > { %529 = vrot.lane.b32.xlu1 %v515_v10, %s3878_s13  ;;  %487 = vrot.lane.b32.xlu0 %v473_v59, %s3879_s14 }
  0xe6   : > { %v1468_v29 = vsel %vm409_vm0, %v1463_v18, %v1464_v20  ;;  %2224 = vmatprep.subr.bf16.mxu1 %v2680_v9 }
  0xe7   : > { %v1412_v8 = vpop.permute.xlu1 %1411  ;;  %v3400_v30 = vpop.permute.xlu0 %1371  ;;  %2225 = vmatpush1.bf16.msra.mxu1 %v2679_v37  ;;  %v1470_v12 = vsel %vm3861_vm13, %v1454_v53, %v1468_v29 }
  0xe8   : > { %v1380_v24 = vrot.slane %v3400_v30, 4  ;;  %v2782_v33 = vcombine.high %v1470_v12, %v1470_v12  ;;  %v2781_v2 = vcombine.low %v1470_v12, %v1470_v12  ;;  %v1421_v49 = vrot.slane %v1412_v8, 4 }
  0xe9   : > { %445 = vrot.lane.b32.xlu1 %v431_v56, %s3880_s19  ;;  %402 = vrot.lane.b32.xlu0 %v388_v31, %s3881_s20 }
  0xea   : > { %2789 = vmatprep.subr.msk.bf16.mxu0 %vm409_vm0, %v2782_v33  ;;  %v2146_v50 = vsel %vm409_vm0, %v2781_v2, 0  ;;  %v1384_v53 = vsel %vm409_vm0, %v1379_v43, %v1380_v24  ;;  %v1405_v2 = vld [vmem:[#allocation2 + $0x24] sm:$0xf] }
  0xeb   : > { %v3406_v42 = vpop.permute.xlu1 %1457  ;;  %v1414_v36 = vpop.permute.xlu0 %1413  ;;  %2190 = vmatpush2.bf16.msra.mxu0 %v2146_v50  ;;  %v1386_v9 = vsel %vm3864_vm15, %v1370_v11, %v1384_v53 }
  0xec   : > { %v1465_v52 = vrot.slane %v3406_v42, 4  ;;  %v1422_v61 = vrot.slane %v1414_v36, 4 }
  0xed   : > { %1375 = vrot.lane.b32.xlu1 %v3037_v7, %s3882_s24  ;;  %1459 = vrot.lane.b32.xlu0 %v3037_v7, %s3883_s27 }
  0xee   : > { %v1471_v63 = vsel %vm409_vm0, %v1464_v20, %v1465_v52  ;;  %v1426_v32 = vsel %vm409_vm0, %v1421_v49, %v1422_v61  ;;  %v1363_v49 = vld [vmem:[#allocation2 + $0x24] sm:$0xf] }
  0xef   : > { %v3421_v60 = vpop.permute.xlu1 %1287  ;;  %v1472_v10 = vsel %vm3861_vm13, %v1456_v45, %v1471_v63  ;;  %v1286_v15 = vpop.permute.xlu0 %1285  ;;  %v1428_v20 = vsel %vm3863_vm11, %v1412_v8, %v1426_v32  ;;  %vm3865_vm13 = vcmask 228352  }
  0xf0   : > { %v2784_v59 = vcombine.high %v1472_v10, %v1472_v10  ;;  %v2783_v13 = vcombine.low %v1472_v10, %v1472_v10  ;;  %v1296_v18 = vrot.slane %v3421_v60, 4  ;;  %v1295_v37 = vrot.slane %v1286_v15, 4 }
  0xf1   : > { %1461 = vrot.lane.b32.xlu1 %v1447_v38, %s3883_s27  ;;  %v2774_v56 = vcombine.high %v1386_v9, %v1428_v20  ;;  %v2773_v29 = vcombine.low %v1386_v9, %v1428_v20  ;;  %1417 = vrot.lane.b32.xlu0 %v3037_v7, %s3884_s15  ;;  %s2499_s27 = scalar_lea.vmem (%p2979_p4), %s3833_s6, %s2983_s30 }
  0xf2   : > { %2791 = vmatprep.subr.msk.bf16.mxu1 %vm409_vm0, %v2784_v59  ;;  %v2152_v45 = vsel %vm409_vm0, %v2783_v13, 0  ;;  %v1300_v11 = vsel %vm409_vm0, %v1295_v37, %v1296_v18 }
  0xf3   : > { %2231 = vmatpush2.bf16.msra.mxu1 %v2152_v45  ;;  %v3433_v31 = vpop.permute.xlu1 %1329  ;;  %2191 = vmatprep.subr.bf16.mxu0 %v2774_v56  ;;  %v1328_v33 = vpop.permute.xlu0 %1327  ;;  %v1302_v38 = vsel %vm3865_vm13, %v1286_v15, %v1300_v11  ;;  %v1321_v11 = vld [vmem:[#allocation2 + $0x24] sm:$0xf] }
  0xf4   : > { %v1338_v12 = vrot.slane %v3433_v31, 4  ;;  %2192 = vmatpush2.bf16.msra.mxu0 %v2773_v29  ;;  %v1337_v8 = vrot.slane %v1328_v33, 4 }
  0xf5   : > { %1333 = vrot.lane.b32.xlu1 %v3037_v7, %s3885_s16  ;;  %1291 = vrot.lane.b32.xlu0 %v3037_v7, %s3886_s12 }
  0xf6   : > { %v1342_v50 = vsel %vm409_vm0, %v1337_v8, %v1338_v12 }
  0xf7   : > { %v3443_v43 = vpop.permute.xlu1 %1415  ;;  %v3447_v63 = vpop.permute.xlu0 %1373  ;;  %v1344_v10 = vsel %vm3866_vm14, %v1328_v33, %v1342_v50 }
  0xf8   : > { %v3869_v53 = vrot.slane %v3443_v43, 4  ;;  %v3874_v32 = vrot.slane %v3447_v63, 4  ;;  %v2766_v13 = vcombine.high %v1302_v38, %v1344_v10  ;;  %v2765_v9 = vcombine.low %v1302_v38, %v1344_v10 }
  0xf9   : > { %1419 = vrot.lane.b32.xlu1 %v1405_v2, %s3884_s15  ;;  %1377 = vrot.lane.b32.xlu0 %v1363_v49, %s3882_s24  ;;  %v1279_v2 = vld [vmem:[#allocation2 + $0x24] sm:$0xf] }
  0xfa   : > { %v1429_v59 = vsel %vm409_vm0, %v1422_v61, %v3869_v53  ;;  %v1387_v15 = vsel %vm409_vm0, %v1380_v24, %v3874_v32  ;;  %2193 = vmatprep.subr.bf16.mxu0 %v2766_v13 }
  0xfb   : > { %v3457_v20 = vpop.permute.xlu1 %1203  ;;  %v1430_v37 = vsel %vm3863_vm11, %v1414_v36, %v1429_v59  ;;  %v1202_v56 = vpop.permute.xlu0 %1201  ;;  %2194 = vmatpush2.bf16.msra.mxu0 %v2765_v9  ;;  %v1388_v61 = vsel %vm3864_vm15, %v3400_v30, %v1387_v15  ;;  %vm1217_vm11 = vcmask 302080   ;;  %vm3870_vm15 = vcmask 236544  }
  0xfc   : > { %v1211_v29 = vrot.slane %v1202_v56, 4  ;;  %v1212_v45 = vrot.slane %v3457_v20, 4  ;;  %v2776_v33 = vcombine.high %v1388_v61, %v1430_v37  ;;  %v2775_v36 = vcombine.low %v1388_v61, %v1430_v37 }
  0xfd   : > { %1249 = vrot.lane.b32.xlu1 %v3037_v7, %s3887_s17  ;;  %1207 = vrot.lane.b32.xlu0 %v3037_v7, %s3888_s18 }
  0xfe   : > { %2232 = vmatprep.subr.bf16.mxu1 %v2776_v33  ;;  %v1216_v30 = vsel %vm409_vm0, %v1211_v29, %v1212_v45 }
  0xff   : > { %v3472_v8 = vpop.permute.xlu1 %1245  ;;  %v1244_v50 = vpop.permute.xlu0 %1243  ;;  %2233 = vmatpush2.bf16.msra.mxu1 %v2775_v36  ;;  %v1218_v9 = vsel %vm1217_vm11, %v1202_v56, %v1216_v30  ;;  %v1237_v36 = vld [vmem:[#allocation2 + $0x24] sm:$0xf] }
 0x100   : > { %v1254_v24 = vrot.slane %v3472_v8, 4  ;;  %v1253_v49 = vrot.slane %v1244_v50, 4 }
 0x101   : > { %1335 = vrot.lane.b32.xlu1 %v1321_v11, %s3885_s16  ;;  %1293 = vrot.lane.b32.xlu0 %v1279_v2, %s3886_s12 }
 0x102   : > { %v1258_v10 = vsel %vm409_vm0, %v1253_v49, %v1254_v24 }
 0x103   : > { %v3480_v38 = vpop.permute.xlu1 %1331  ;;  %v3484_v13 = vpop.permute.xlu0 %1289  ;;  %v1260_v37 = vsel %vm3870_vm15, %v1244_v50, %v1258_v10  ;;  %v1195_v50 = vld [vmem:[#allocation2 + $0x24] sm:$0xf] }
 0x104   : > { %v3868_v59 = vrot.slane %v3480_v38, 4  ;;  %v3867_v15 = vrot.slane %v3484_v13, 4  ;;  %v2758_v29 = vcombine.high %v1218_v9, %v1260_v37  ;;  %v2757_v33 = vcombine.low %v1218_v9, %v1260_v37 }
 0x105   : > { %1165 = vrot.lane.b32.xlu1 %v3037_v7, %s2919_s7  ;;  %1123 = vrot.lane.b32.xlu0 %v3037_v7, %s2918_s9 }
 0x106   : > { %v1345_v61 = vsel %vm409_vm0, %v1338_v12, %v3868_v59  ;;  %v1303_v56 = vsel %vm409_vm0, %v1296_v18, %v3867_v15  ;;  %2195 = vmatprep.subr.bf16.mxu0 %v2758_v29 }
 0x107   : > { %v3496_v11 = vpop.permute.xlu1 %1119  ;;  %v1346_v2 = vsel %vm3866_vm14, %v3433_v31, %v1345_v61  ;;  %v1118_v12 = vpop.permute.xlu0 %1117  ;;  %2196 = vmatpush2.bf16.msra.mxu0 %v2757_v33  ;;  %v1304_v30 = vsel %vm3865_vm13, %v3421_v60, %v1303_v56  ;;  %v1153_v33 = vld [vmem:[#allocation2 + $0x24] sm:$0xf]  ;;  %vm1133_vm13 = vcmask 318464   ;;  %vm1175_vm14 = vcmask 310272  }
 0x108   : > { %v1127_v49 = vrot.slane %v1118_v12, 4  ;;  %v1128_v10 = vrot.slane %v3496_v11, 4  ;;  %v2768_v9 = vcombine.high %v1304_v30, %v1346_v2  ;;  %v2767_v31 = vcombine.low %v1304_v30, %v1346_v2 }
 0x109   : > { %1251 = vrot.lane.b32.xlu1 %v1237_v36, %s3887_s17  ;;  %1209 = vrot.lane.b32.xlu0 %v1195_v50, %s3888_s18  ;;  %v1111_v50 = vld [vmem:[#allocation2 + $0x24] sm:$0xf] }
 0x10a   : > { %2234 = vmatprep.subr.bf16.mxu1 %v2768_v9  ;;  %v1132_v29 = vsel %vm409_vm0, %v1127_v49, %v1128_v10 }
 0x10b   : > { %v1162_v37 = vpop.permute.xlu1 %1161  ;;  %v1160_v18 = vpop.permute.xlu0 %1159  ;;  %2235 = vmatpush2.bf16.msra.mxu1 %v2767_v31  ;;  %v1134_v49 = vsel %vm1133_vm13, %v1118_v12, %v1132_v29 }
 0x10c   : > { %v1170_v61 = vrot.slane %v1162_v37, 4  ;;  %v1169_v60 = vrot.slane %v1160_v18, 4 }
 0x10d   : > { %1081 = vrot.lane.b32.xlu1 %v3037_v7, %s2921_s11  ;;  %1039 = vrot.lane.b32.xlu0 %v3037_v7, %s2920_s23 }
 0x10e   : > { %v1174_v2 = vsel %vm409_vm0, %v1169_v60, %v1170_v61  ;;  %v1069_v60 = vld [vmem:[#allocation2 + $0x24] sm:$0xf] }
 0x10f   : > { %v3517_v36 = vpop.permute.xlu1 %1247  ;;  %v3521_v30 = vpop.permute.xlu0 %1205  ;;  %v1176_v9 = vsel %vm1175_vm14, %v1160_v18, %v1174_v2  ;;  %v1027_v18 = vld [vmem:[#allocation2 + $0x24] sm:$0xf] }
 0x110   : > { %v3873_v56 = vrot.slane %v3517_v36, 4  ;;  %v3872_v31 = vrot.slane %v3521_v30, 4  ;;  %v2750_v15 = vcombine.high %v1134_v49, %v1176_v9  ;;  %v2749_v59 = vcombine.low %v1134_v49, %v1176_v9 }
 0x111   : > { %1167 = vrot.lane.b32.xlu1 %v1153_v33, %s2919_s7  ;;  %1125 = vrot.lane.b32.xlu0 %v1111_v50, %s2918_s9  ;;  %s3921_s7 = sshll.u32 %s2988_s8, 2  ;;  %s327_s8 = sand.u32 1, %s2886_s21  }
 0x112   : > { %v1261_v7 = vsel %vm409_vm0, %v1254_v24, %v3873_v56  ;;  %v1219_v12 = vsel %vm409_vm0, %v1212_v45, %v3872_v31  ;;  %2197 = vmatprep.subr.bf16.mxu0 %v2750_v15  ;;  %s3797_s13 = scalar_lea.vmem %s3832_s5, %s3921_s7  ;;  %s2656_s14 = sshll.u32 %s327_s8, 4 }
 0x113   : > { %v3531_v53 = vpop.permute.xlu1 %1035  ;;  %v1262_v33 = vsel %vm3870_vm15, %v3472_v8, %v1261_v7  ;;  %v1034_v29 = vpop.permute.xlu0 %1033  ;;  %2198 = vmatpush2.bf16.msra.mxu0 %v2749_v59  ;;  %v1220_v24 = vsel %vm1217_vm11, %v3457_v20, %v1219_v12  ;;  %vm1049_vm15 = vcmask 965632   ;;  %s329_s19 = scalar_lea.vmem [#allocation4], %s2656_s14 }
 0x114   : > { %v1043_v2 = vrot.slane %v1034_v29, 4  ;;  %v1044_v50 = vrot.slane %v3531_v53, 4  ;;  %v2760_v49 = vcombine.high %v1220_v24, %v1262_v33  ;;  %v2759_v8 = vcombine.low %v1220_v24, %v1262_v33 }
 0x115   : > { %1083 = vrot.lane.b32.xlu1 %v1069_v60, %s2921_s11  ;;  %1041 = vrot.lane.b32.xlu0 %v1027_v18, %s2920_s23 }
 0x116   : > { %2236 = vmatprep.subr.bf16.mxu1 %v2760_v49  ;;  %v1048_v15 = vsel %vm409_vm0, %v1043_v2, %v1044_v50 }
 0x117   : > { %v1078_v9 = vpop.permute.xlu1 %1077  ;;  %v1076_v45 = vpop.permute.xlu0 %1075  ;;  %2237 = vmatpush2.bf16.msra.mxu1 %v2759_v8  ;;  %v1050_v33 = vsel %vm1049_vm15, %v1034_v29, %v1048_v15 }
 0x118   : > { %v1086_v7 = vrot.slane %v1078_v9, 4  ;;  %v1085_v59 = vrot.slane %v1076_v45, 4 }
 0x11a   : > { %v1090_v20 = vsel %vm409_vm0, %v1085_v59, %v1086_v7 }
 0x11b   : > { %v3546_v60 = vpop.permute.xlu1 %1163  ;;  %v3550_v31 = vpop.permute.xlu0 %1121  ;;  %v1092_v18 = vsel %vm1091_vm12, %v1076_v45, %v1090_v20  ;;  %v3566_v45 = vcombine.low %v3180_v62, %v3180_v62 }
 0x11c   : > { %v3876_v12 = vrot.slane %v3546_v60, 4  ;;  %v3875_v24 = vrot.slane %v3550_v31, 4  ;;  %v2742_v49 = vcombine.high %v1050_v33, %v1092_v18  ;;  %v2741_v8 = vcombine.low %v1050_v33, %v1092_v18 }
 0x11e   : > { %v1177_v2 = vsel %vm409_vm0, %v1170_v61, %v3876_v12  ;;  %v1135_v59 = vsel %vm409_vm0, %v1128_v10, %v3875_v24  ;;  %2199 = vmatprep.subr.bf16.mxu0 %v2742_v49 }
 0x11f   : > { %v998_v56 = vpop.permute.xlu1 %997  ;;  %v1178_v32 = vsel %vm1175_vm14, %v1162_v37, %v1177_v2  ;;  %v956_v15 = vpop.permute.xlu0 %955  ;;  %2200 = vmatpush2.bf16.msra.mxu0 %v2741_v8  ;;  %v1136_v61 = vsel %vm1133_vm13, %v3496_v11, %v1135_v59 }
 0x120   : > { %v1004_v29 = vrot.slane %v998_v56, 4  ;;  %v962_v20 = vrot.slane %v956_v15, 4  ;;  %v2752_v33 = vcombine.high %v1136_v61, %v1178_v32  ;;  %v2751_v18 = vcombine.low %v1136_v61, %v1178_v32 }
 0x122   : > { %v1011_v37 = vsel %vm409_vm0, %v1003_v27, %v1004_v29  ;;  %v969_v62 = vsel %vm409_vm0, %v961_v23, %v962_v20  ;;  %2238 = vmatprep.subr.bf16.mxu1 %v2752_v33  ;;  %2202 = vmatmul.mubr.bf16.vlgmr.msra.gmra.mxu0 %v3566_v45 }
 0x123   : > { %v3573_v2 = vpop.permute.xlu1 %1079  ;;  %v1012_v10 = vsel %vm1007_vm2, %v3119_v26, %v1011_v37  ;;  %v3582_v11 = vpop.permute.xlu0 %1037  ;;  %2239 = vmatpush2.bf16.msra.mxu1 %v2751_v18  ;;  %v970_v27 = vsel %vm965_vm1, %v3108_v19, %v969_v62  ;;  %2794 = vmatprep.mubr.msk.bf16.mxu0 %vm2140_vm6, %v3187_v5 }
 0x124   : > { %v1087_v49 = vrot.slane %v3573_v2, 4  ;;  %v1045_v26 = vrot.slane %v3582_v11, 4  ;;  %v2737_v32 = vcombine.low %v970_v27, %v1012_v10  ;;  %v2738_v8 = vcombine.high %v970_v27, %v1012_v10  ;;  %v933_v10 = vld [vmem:[#allocation2 + $0x14] sm:$0xff] }
 0x126   : > { %v1093_v23 = vsel %vm409_vm0, %v1086_v7, %v1087_v49  ;;  %v1051_v37 = vsel %vm409_vm0, %v1044_v50, %v1045_v26  ;;  %2251 = vmatprep.subr.bf16.mxu0 %v2738_v8 }
 0x127   : > { %v958_v59 = vpop.permute.xlu1 %957  ;;  %v1094_v61 = vsel %vm1091_vm12, %v1078_v9, %v1093_v23  ;;  %v906_v19 = vpop.permute.xlu0 %905  ;;  %2252 = vmatpush1.bf16.msra.mxu0 %v2737_v32  ;;  %v1052_v33 = vsel %vm1049_vm15, %v3531_v53, %v1051_v37 }
 0x128   : > { %v912_v18 = vrot.slane %v906_v19, 4  ;;  %v963_v62 = vrot.slane %v958_v59, 4  ;;  %v2744_v24 = vcombine.high %v1052_v33, %v1094_v61  ;;  %v2743_v12 = vcombine.low %v1052_v33, %v1094_v61 }
 0x12a   : > { %v919_v9 = vsel %vm409_vm0, %v911_v55, %v912_v18  ;;  %2240 = vmatprep.subr.bf16.mxu1 %v2744_v24  ;;  %v971_v53 = vsel %vm409_vm0, %v962_v20, %v963_v62 }
 0x12b   : > { %v3598_v7 = vpop.permute.xlu1 %821  ;;  %v1000_v27 = vpop.permute.xlu0 %999  ;;  %2241 = vmatpush2.bf16.msra.mxu1 %v2743_v12  ;;  %v920_v23 = vsel %vm915_vm3, %v3161_v54, %v919_v9  ;;  %v972_v54 = vsel %vm965_vm1, %v956_v15, %v971_v53  ;;  %v2871_v15 = vld [vmem:[#allocation2 + $0x1c] sm:$0xff]  ;;  %vm3889_vm1 = vcmask 809984  }
 0x12c   : > { %v828_v50 = vrot.slane %v3598_v7, 4  ;;  %v1005_v32 = vrot.slane %v1000_v27, 4  ;;  %v2729_v8 = vcombine.low %v920_v23, %v933_v10  ;;  %v2730_v59 = vcombine.high %v920_v23, %v933_v10 }
 0x12e   : > { %v1013_v37 = vsel %vm409_vm0, %v1004_v29, %v1005_v32  ;;  %2253 = vmatprep.subr.bf16.mxu0 %v2730_v59  ;;  %2243 = vmatmul.mubr.bf16.vlgmr.msra.gmra.mxu1 %v3566_v45  ;;  %v835_v55 = vsel %vm409_vm0, %v827_v0, %v828_v50 }
 0x12f   : > { %v908_v61 = vpop.permute.xlu1 %907  ;;  %v864_v12 = vpop.permute.xlu0 %863  ;;  %2254 = vmatpush1.bf16.msra.mxu0 %v2729_v8  ;;  %v1014_v24 = vsel %vm1007_vm2, %v998_v56, %v1013_v37  ;;  %2796 = vmatprep.mubr.msk.bf16.mxu1 %vm2140_vm6, %v3187_v5  ;;  %v836_v5 = vsel %vm831_vm4, %v3191_v6, %v835_v55  ;;  %vm3890_vm2 = vcmask 818176  }
 0x130   : > { %v913_v33 = vrot.slane %v908_v61, 4  ;;  %v870_v20 = vrot.slane %v864_v12, 4  ;;  %v2739_v62 = vcombine.low %v972_v54, %v1014_v24  ;;  %v2740_v10 = vcombine.high %v972_v54, %v1014_v24  ;;  %vm3894_vm6 = vmmov %vm3890_vm2 }
 0x132   : > { %v921_v29 = vsel %vm409_vm0, %v912_v18, %v913_v33  ;;  %v877_v0 = vsel %vm409_vm0, %v869_v17, %v870_v20  ;;  %2292 = vmatprep.subr.bf16.mxu1 %v2740_v10 }
 0x133   : > { %v780_v9 = vpop.permute.xlu1 %779  ;;  %v922_v27 = vsel %vm915_vm3, %v906_v19, %v921_v29  ;;  %v738_v56 = vpop.permute.xlu0 %737  ;;  %2293 = vmatpush1.bf16.msra.mxu1 %v2739_v62  ;;  %v878_v18 = vsel %vm873_vm5, %v3209_v14, %v877_v0  ;;  %vm3891_vm3 = vcmask 826368  }
 0x134   : > { %v786_v23 = vrot.slane %v780_v9, 4  ;;  %v2732_v53 = vcombine.high %v922_v27, %v2871_v15  ;;  %v2731_v32 = vcombine.low %v922_v27, %v2871_v15  ;;  %v744_v8 = vrot.slane %v738_v56, 4 }
 0x135   : > { %v2721_v59 = vcombine.low %v836_v5, %v878_v18  ;;  %v2722_v17 = vcombine.high %v836_v5, %v878_v18 }
 0x136   : > { %v793_v19 = vsel %vm409_vm0, %v785_v47, %v786_v23  ;;  %2294 = vmatprep.subr.bf16.mxu1 %v2732_v53  ;;  %v751_v6 = vsel %vm409_vm0, %v743_v40, %v744_v8 }
 0x137   : > { %v866_v61 = vpop.permute.xlu1 %865  ;;  %v794_v37 = vsel %vm789_vm8, %v3254_v44, %v793_v19  ;;  %2255 = vmatprep.subr.bf16.mxu0 %v2722_v17  ;;  %v824_v14 = vpop.permute.xlu0 %823  ;;  %2295 = vmatpush1.bf16.msra.mxu1 %v2731_v32  ;;  %v752_v55 = vsel %vm747_vm7, %v3239_v35, %v751_v6 }
 0x138   : > { %v871_v33 = vrot.slane %v866_v61, 4  ;;  %2256 = vmatpush1.bf16.msra.mxu0 %v2721_v59  ;;  %v829_v47 = vrot.slane %v824_v14, 4  ;;  %v2713_v24 = vcombine.low %v752_v55, %v794_v37  ;;  %v2714_v29 = vcombine.high %v752_v55, %v794_v37 }
 0x13a   : > { %v879_v54 = vsel %vm409_vm0, %v870_v20, %v871_v33  ;;  %v837_v10 = vsel %vm409_vm0, %v828_v50, %v829_v47  ;;  %2257 = vmatprep.subr.bf16.mxu0 %v2714_v29 }
 0x13b   : > { %v696_v62 = vpop.permute.xlu1 %695  ;;  %v880_v44 = vsel %vm873_vm5, %v864_v12, %v879_v54  ;;  %v654_v27 = vpop.permute.xlu0 %653  ;;  %v838_v0 = vsel %vm831_vm4, %v3598_v7, %v837_v10  ;;  %vm3892_vm4 = vcmask 891904   ;;  %vm3893_vm5 = vmmov %vm3889_vm1 }
 0x13c   : > { %v702_v40 = vrot.slane %v696_v62, 4  ;;  %2258 = vmatpush1.bf16.msra.mxu0 %v2713_v24  ;;  %v660_v15 = vrot.slane %v654_v27, 4  ;;  %v2723_v20 = vcombine.low %v838_v0, %v880_v44  ;;  %v2724_v53 = vcombine.high %v838_v0, %v880_v44 }
 0x13e   : > { %v709_v35 = vsel %vm409_vm0, %v701_v21, %v702_v40  ;;  %v667_v50 = vsel %vm409_vm0, %v659_v1, %v660_v15  ;;  %2296 = vmatprep.subr.bf16.mxu1 %v2724_v53 }
 0x13f   : > { %v782_v5 = vpop.permute.xlu1 %781  ;;  %v710_v12 = vsel %vm705_vm10, %v3294_v16, %v709_v35  ;;  %v740_v32 = vpop.permute.xlu0 %739  ;;  %2297 = vmatpush1.bf16.msra.mxu1 %v2723_v20  ;;  %v668_v7 = vsel %vm663_vm9, %v3280_v3, %v667_v50 }
 0x140   : > { %v787_v18 = vrot.slane %v782_v5, 4  ;;  %v745_v19 = vrot.slane %v740_v32, 4  ;;  %v2705_v59 = vcombine.low %v668_v7, %v710_v12  ;;  %v2706_v17 = vcombine.high %v668_v7, %v710_v12 }
 0x142   : > { %v795_v21 = vsel %vm409_vm0, %v786_v23, %v787_v18  ;;  %v753_v16 = vsel %vm409_vm0, %v744_v8, %v745_v19  ;;  %2259 = vmatprep.subr.bf16.mxu0 %v2706_v17 }
 0x143   : > { %v612_v61 = vpop.permute.xlu1 %611  ;;  %v796_v37 = vsel %vm789_vm8, %v780_v9, %v795_v21  ;;  %v570_v1 = vpop.permute.xlu0 %569  ;;  %2260 = vmatpush1.bf16.msra.mxu0 %v2705_v59  ;;  %v754_v33 = vsel %vm747_vm7, %v738_v56, %v753_v16  ;;  %vm3895_vm7 = vcmask 900096   ;;  %vm3896_vm8 = vcmask 908288  }
 0x144   : > { %v618_v6 = vrot.slane %v612_v61, 4  ;;  %v576_v14 = vrot.slane %v570_v1, 4  ;;  %v2715_v55 = vcombine.low %v754_v33, %v796_v37  ;;  %v2716_v23 = vcombine.high %v754_v33, %v796_v37 }
 0x146   : > { %v625_v3 = vsel %vm409_vm0, %v617_v58, %v618_v6  ;;  %v583_v9 = vsel %vm409_vm0, %v575_v46, %v576_v14  ;;  %2298 = vmatprep.subr.bf16.mxu1 %v2716_v23 }
 0x147   : > { %v698_v47 = vpop.permute.xlu1 %697  ;;  %v626_v54 = vsel %vm3889_vm1, %v3330_v51, %v625_v3  ;;  %v656_v24 = vpop.permute.xlu0 %655  ;;  %2299 = vmatpush1.bf16.msra.mxu1 %v2715_v55  ;;  %v584_v56 = vsel %vm3890_vm2, %v3320_v39, %v583_v9  ;;  %vm3899_vm1 = vmmov %vm3895_vm7 }
 0x148   : > { %v703_v8 = vrot.slane %v698_v47, 4  ;;  %v661_v29 = vrot.slane %v656_v24, 4  ;;  %v2697_v44 = vcombine.low %v584_v56, %v626_v54  ;;  %v2698_v10 = vcombine.high %v584_v56, %v626_v54  ;;  %vm3900_vm2 = vmmov %vm3896_vm8 }
 0x14a   : > { %v711_v58 = vsel %vm409_vm0, %v702_v40, %v703_v8  ;;  %v669_v51 = vsel %vm409_vm0, %v660_v15, %v661_v29  ;;  %2261 = vmatprep.subr.bf16.mxu0 %v2698_v10 }
 0x14b   : > { %v528_v0 = vpop.permute.xlu1 %527  ;;  %v712_v35 = vsel %vm705_vm10, %v696_v62, %v711_v58  ;;  %v486_v46 = vpop.permute.xlu0 %485  ;;  %2262 = vmatpush1.bf16.msra.mxu0 %v2697_v44  ;;  %v670_v53 = vsel %vm663_vm9, %v654_v27, %v669_v51  ;;  %vm3897_vm9 = vmmov %vm3891_vm3 }
 0x14c   : > { %v534_v20 = vrot.slane %v528_v0, 4  ;;  %v492_v5 = vrot.slane %v486_v46, 4  ;;  %v2707_v12 = vcombine.low %v670_v53, %v712_v35  ;;  %v2708_v40 = vcombine.high %v670_v53, %v712_v35  ;;  %vm3898_vm10 = vmmov %vm3892_vm4 }
 0x14e   : > { %v541_v39 = vsel %vm409_vm0, %v533_v25, %v534_v20  ;;  %v499_v62 = vsel %vm409_vm0, %v491_v28, %v492_v5  ;;  %2300 = vmatprep.subr.bf16.mxu1 %v2708_v40 }
 0x14f   : > { %v614_v50 = vpop.permute.xlu1 %613  ;;  %v542_v18 = vsel %vm3891_vm3, %v3367_v41, %v541_v39  ;;  %v572_v32 = vpop.permute.xlu0 %571  ;;  %2301 = vmatpush1.bf16.msra.mxu1 %v2707_v12  ;;  %v500_v27 = vsel %vm3892_vm4, %v3353_v22, %v499_v62  ;;  %vm3902_vm3 = vcmask 138240  }
 0x150   : > { %v619_v15 = vrot.slane %v614_v50, 4  ;;  %v577_v7 = vrot.slane %v572_v32, 4  ;;  %v2689_v19 = vcombine.low %v500_v27, %v542_v18  ;;  %v2690_v21 = vcombine.high %v500_v27, %v542_v18  ;;  %vm3903_vm4 = vmmov %vm3902_vm3 }
 0x152   : > { %v627_v25 = vsel %vm409_vm0, %v618_v6, %v619_v15  ;;  %v585_v41 = vsel %vm409_vm0, %v576_v14, %v577_v7  ;;  %2263 = vmatprep.subr.bf16.mxu0 %v2690_v21  ;;  %v3901_v15 = vrot.slane %v3447_v63, 4 }
 0x153   : > { %v444_v59 = vpop.permute.xlu1 %443  ;;  %v628_v17 = vsel %vm3893_vm5, %v612_v61, %v627_v25  ;;  %v401_v28 = vpop.permute.xlu0 %400  ;;  %2264 = vmatpush1.bf16.msra.mxu0 %v2689_v19  ;;  %v586_v16 = vsel %vm3894_vm6, %v570_v1, %v585_v41  ;;  %vm3905_vm5 = vcmask 154624   ;;  %vm3906_vm6 = vcmask 146432  }
 0x154   : > { %v450_v37 = vrot.slane %v444_v59, 4  ;;  %v407_v33 = vrot.slane %v401_v28, 4  ;;  %v2699_v3 = vcombine.low %v586_v16, %v628_v17  ;;  %v2700_v6 = vcombine.high %v586_v16, %v628_v17 }
 0x156   : > { %v457_v22 = vsel %vm409_vm0, %v449_v4, %v450_v37  ;;  %v415_v61 = vsel %vm409_vm0, %v406_v48, %v407_v33  ;;  %2302 = vmatprep.subr.bf16.mxu1 %v2700_v6 }
 0x157   : > { %v530_v55 = vpop.permute.xlu1 %529  ;;  %v458_v23 = vsel %vm3895_vm7, %v3378_v57, %v457_v22  ;;  %v488_v47 = vpop.permute.xlu0 %487  ;;  %2303 = vmatpush1.bf16.msra.mxu1 %v2699_v3  ;;  %v416_v1 = vsel %vm3896_vm8, %v3361_v34, %v415_v61  ;;  %vm3908_vm7 = vcmask 220160   ;;  %vm3910_vm8 = vcmask 228352  }
 0x158   : > { %v535_v14 = vrot.slane %v530_v55, 4  ;;  %v493_v54 = vrot.slane %v488_v47, 4  ;;  %v2681_v9 = vcombine.low %v416_v1, %v458_v23  ;;  %v2682_v8 = vcombine.high %v416_v1, %v458_v23 }
 0x159   : > { %v3907_v23 = vrot.slane %v3480_v38, 4 }
 0x15a   : > { %v543_v4 = vsel %vm409_vm0, %v534_v20, %v535_v14  ;;  %v501_v57 = vsel %vm409_vm0, %v492_v5, %v493_v54  ;;  %2265 = vmatprep.subr.bf16.mxu0 %v2682_v8 }
 0x15b   : > { %v446_v24 = vpop.permute.xlu1 %445  ;;  %v544_v56 = vsel %vm3897_vm9, %v528_v0, %v543_v4  ;;  %v403_v48 = vpop.permute.xlu0 %402  ;;  %2266 = vmatpush1.bf16.msra.mxu0 %v2681_v9  ;;  %v502_v58 = vsel %vm3898_vm10, %v486_v46, %v501_v57  ;;  %vm3911_vm9 = vmmov %vm3906_vm6 }
 0x15c   : > { %v451_v29 = vrot.slane %v446_v24, 4  ;;  %v408_v44 = vrot.slane %v403_v48, 4  ;;  %v2691_v34 = vcombine.low %v502_v58, %v544_v56  ;;  %v2692_v35 = vcombine.high %v502_v58, %v544_v56  ;;  %vm3912_vm10 = vmmov %vm3905_vm5 }
 0x15e   : > { %v459_v10 = vsel %vm409_vm0, %v450_v37, %v451_v29  ;;  %v417_v53 = vsel %vm409_vm0, %v407_v33, %v408_v44  ;;  %2304 = vmatprep.subr.bf16.mxu1 %v2692_v35 }
 0x15f   : > { %v1376_v51 = vpop.permute.xlu1 %1375  ;;  %v460_v20 = vsel %vm3899_vm1, %v444_v59, %v459_v10  ;;  %v1460_v0 = vpop.permute.xlu0 %1459  ;;  %2305 = vmatpush1.bf16.msra.mxu1 %v2691_v34  ;;  %v418_v39 = vsel %vm3900_vm2, %v401_v28, %v417_v53  ;;  %v3913_v53 = vrot.slane %v3517_v36, 4  ;;  %vm3914_vm1 = vcmask 236544   ;;  %vm3916_vm2 = vmmov %vm3908_vm7 }
 0x160   : > { %v1382_v5 = vrot.slane %v1376_v51, 4  ;;  %v1466_v12 = vrot.slane %v1460_v0, 4  ;;  %v2683_v40 = vcombine.low %v418_v39, %v460_v20  ;;  %v2684_v50 = vcombine.high %v418_v39, %v460_v20 }
 0x162   : > { %v1473_v18 = vsel %vm409_vm0, %v1465_v52, %v1466_v12  ;;  %2306 = vmatprep.subr.bf16.mxu1 %v2684_v50  ;;  %v1389_v32 = vsel %vm409_vm0, %v3901_v15, %v1382_v5  ;;  %v3904_v52 = vrot.slane %v3443_v43, 4  ;;  %v3915_v50 = vrot.slane %v3521_v30, 4 }
 0x163   : > { %v1462_v46 = vpop.permute.xlu1 %1461  ;;  %v1418_v27 = vpop.permute.xlu0 %1417  ;;  %2307 = vmatpush1.bf16.msra.mxu1 %v2683_v40  ;;  %v1474_v7 = vsel %vm3902_vm3, %v3406_v42, %v1473_v18  ;;  %v1390_v42 = vsel %vm3905_vm5, %v3447_v63, %v1389_v32  ;;  %v3909_v63 = vrot.slane %v3484_v13, 4  ;;  %vm3917_vm3 = vmmov %vm3910_vm8 }
 0x164   : > { %v1467_v62 = vrot.slane %v1462_v46, 4  ;;  %v1424_v25 = vrot.slane %v1418_v27, 4  ;;  %v2786_v21 = vcombine.high %v1474_v7, %v1474_v7  ;;  %v2785_v59 = vcombine.low %v1474_v7, %v1474_v7 }
 0x166   : > { %v1475_v19 = vsel %vm409_vm0, %v1466_v12, %v1467_v62  ;;  %v1431_v37 = vsel %vm409_vm0, %v3904_v52, %v1424_v25  ;;  %2793 = vmatprep.subr.msk.bf16.mxu0 %vm409_vm0, %v2786_v21  ;;  %v2158_v28 = vsel %vm409_vm0, %v2785_v59, 0  ;;  %v3918_v52 = vrot.slane %v3546_v60, 4 }
 0x167   : > { %v1476_v17 = vsel %vm3903_vm4, %v1460_v0, %v1475_v19  ;;  %v1334_v41 = vpop.permute.xlu1 %1333  ;;  %v1292_v22 = vpop.permute.xlu0 %1291  ;;  %2272 = vmatpush2.bf16.msra.mxu0 %v2158_v28  ;;  %v1432_v3 = vsel %vm3906_vm6, %v3443_v43, %v1431_v37  ;;  %vm3920_vm4 = vmmov %vm3914_vm1 }
 0x168   : > { %v1340_v16 = vrot.slane %v1334_v41, 4  ;;  %v2788_v33 = vcombine.high %v1476_v17, %v1476_v17  ;;  %v2787_v6 = vcombine.low %v1476_v17, %v1476_v17  ;;  %v1298_v55 = vrot.slane %v1292_v22, 4 }
 0x169   : > { %v2777_v14 = vcombine.low %v1390_v42, %v1432_v3  ;;  %v2778_v47 = vcombine.high %v1390_v42, %v1432_v3 }
 0x16a   : > { %v1347_v61 = vsel %vm409_vm0, %v3907_v23, %v1340_v16  ;;  %2795 = vmatprep.subr.msk.bf16.mxu1 %vm409_vm0, %v2788_v33  ;;  %v2164_v1 = vsel %vm409_vm0, %v2787_v6, 0  ;;  %v1305_v43 = vsel %vm409_vm0, %v3909_v63, %v1298_v55 }
 0x16b   : > { %v1420_v54 = vpop.permute.xlu1 %1419  ;;  %v1348_v4 = vsel %vm3908_vm7, %v3480_v38, %v1347_v61  ;;  %2273 = vmatprep.subr.bf16.mxu0 %v2778_v47  ;;  %2313 = vmatpush2.bf16.msra.mxu1 %v2164_v1  ;;  %v1378_v8 = vpop.permute.xlu0 %1377  ;;  %v1306_v24 = vsel %vm3910_vm8, %v3484_v13, %v1305_v43 }
 0x16c   : > { %v1425_v9 = vrot.slane %v1420_v54, 4  ;;  %2274 = vmatpush2.bf16.msra.mxu0 %v2777_v14  ;;  %v1383_v56 = vrot.slane %v1378_v8, 4  ;;  %v2769_v29 = vcombine.low %v1306_v24, %v1348_v4  ;;  %v2770_v48 = vcombine.high %v1306_v24, %v1348_v4 }
 0x16e   : > { %v1433_v57 = vsel %vm409_vm0, %v1424_v25, %v1425_v9  ;;  %v1391_v44 = vsel %vm409_vm0, %v1382_v5, %v1383_v56  ;;  %2275 = vmatprep.subr.bf16.mxu0 %v2770_v48 }
 0x16f   : > { %v1250_v58 = vpop.permute.xlu1 %1249  ;;  %v1434_v38 = vsel %vm3911_vm9, %v1418_v27, %v1433_v57  ;;  %v1208_v34 = vpop.permute.xlu0 %1207  ;;  %v1392_v35 = vsel %vm3912_vm10, %v1376_v51, %v1391_v44 }
 0x170   : > { %v1256_v10 = vrot.slane %v1250_v58, 4  ;;  %2276 = vmatpush2.bf16.msra.mxu0 %v2769_v29  ;;  %v1214_v20 = vrot.slane %v1208_v34, 4  ;;  %v2779_v0 = vcombine.low %v1392_v35, %v1434_v38  ;;  %v2780_v39 = vcombine.high %v1392_v35, %v1434_v38 }
 0x172   : > { %v1263_v13 = vsel %vm409_vm0, %v3913_v53, %v1256_v10  ;;  %v1221_v5 = vsel %vm409_vm0, %v3915_v50, %v1214_v20  ;;  %2314 = vmatprep.subr.bf16.mxu1 %v2780_v39 }
 0x173   : > { %v1336_v12 = vpop.permute.xlu1 %1335  ;;  %v1264_v40 = vsel %vm3914_vm1, %v3517_v36, %v1263_v13  ;;  %v1294_v18 = vpop.permute.xlu0 %1293  ;;  %2315 = vmatpush2.bf16.msra.mxu1 %v2779_v0  ;;  %v1222_v51 = vsel %vm1217_vm11, %v3521_v30, %v1221_v5 }
 0x174   : > { %v1341_v46 = vrot.slane %v1336_v12, 4  ;;  %v1299_v62 = vrot.slane %v1294_v18, 4  ;;  %v2761_v32 = vcombine.low %v1222_v51, %v1264_v40  ;;  %v2762_v27 = vcombine.high %v1222_v51, %v1264_v40 }
 0x175   : > { %v2374_v18 = vlaneseq }
 0x176   : > { %v1349_v15 = vsel %vm409_vm0, %v1340_v16, %v1341_v46  ;;  %v1307_v36 = vsel %vm409_vm0, %v1298_v55, %v1299_v62  ;;  %2277 = vmatprep.subr.bf16.mxu0 %v2762_v27  ;;  %v2369_v62 = vld [vmem:[%s363_s26] sm:$0xff] }
 0x177   : > { %v1166_v7 = vpop.permute.xlu1 %1165  ;;  %v1350_v25 = vsel %vm3916_vm2, %v1334_v41, %v1349_v15  ;;  %v1124_v21 = vpop.permute.xlu0 %1123  ;;  %2278 = vmatpush2.bf16.msra.mxu0 %v2761_v32  ;;  %v1308_v59 = vsel %vm3917_vm3, %v1292_v22, %v1307_v36  ;;  %v3919_v41 = vrot.slane %v3550_v31, 4  ;;  %v2375_v51 = vshrl.u32 %v2374_v18, 7 }
 0x178   : > { %v1172_v19 = vrot.slane %v1166_v7, 4  ;;  %v1130_v17 = vrot.slane %v1124_v21, 4  ;;  %v2771_v37 = vcombine.low %v1308_v59, %v1350_v25  ;;  %v2772_v28 = vcombine.high %v1308_v59, %v1350_v25 }
 0x179   : > { %v2370_v15 = vunpack.c.l.bf16 %v2369_v62  ;;  %v3787_v32 = vsub.s32 0, %v2375_v51  ;;  %v2380_v27 = vsub.s32 2, %v2375_v51  ;;  %v2384_v59 = vsub.s32 4, %v2375_v51 }
 0x17a   : > { %v1179_v30 = vsel %vm409_vm0, %v3918_v52, %v1172_v19  ;;  %v1137_v42 = vsel %vm409_vm0, %v3919_v41, %v1130_v17  ;;  %2316 = vmatprep.subr.bf16.mxu1 %v2772_v28  ;;  %v2388_v28 = vsub.s32 6, %v2375_v51 }
 0x17b   : > { %v1252_v16 = vpop.permute.xlu1 %1251  ;;  %v1180_v33 = vsel %vm1175_vm14, %v3546_v60, %v1179_v30  ;;  %v1210_v6 = vpop.permute.xlu0 %1209  ;;  %2317 = vmatpush2.bf16.msra.mxu1 %v2771_v37  ;;  %v1138_v22 = vsel %vm1133_vm13, %v3550_v31, %v1137_v42  ;;  %v2381_v25 = vrot.slane %v2370_v15, %v2380_v27  ;;  %v2385_v42 = vrot.slane %v2370_v15, %v2384_v59 }
 0x17c   : > { %v1257_v3 = vrot.slane %v1252_v16, 4  ;;  %v1215_v55 = vrot.slane %v1210_v6, 4  ;;  %v2753_v61 = vcombine.low %v1138_v22, %v1180_v33  ;;  %v2754_v14 = vcombine.high %v1138_v22, %v1180_v33 }
 0x17d   : > { %v2389_v22 = vrot.slane %v2370_v15, %v2388_v28 }
 0x17e   : > { %v1265_v23 = vsel %vm409_vm0, %v1256_v10, %v1257_v3  ;;  %v1223_v60 = vsel %vm409_vm0, %v1214_v20, %v1215_v55  ;;  %2279 = vmatprep.subr.bf16.mxu0 %v2754_v14  ;;  %v2425_v55 = vrot.slane %v2385_v42, %v3787_v32 }
 0x17f   : > { %v1082_v47 = vpop.permute.xlu1 %1081  ;;  %v1266_v1 = vsel %vm3920_vm4, %v1250_v58, %v1265_v23  ;;  %v1040_v4 = vpop.permute.xlu0 %1039  ;;  %2280 = vmatpush2.bf16.msra.mxu0 %v2753_v61  ;;  %v1224_v63 = vsel %vm1217_vm11, %v1208_v34, %v1223_v60  ;;  %v2429_v23 = vrot.slane %v2389_v22, %v3787_v32 }
 0x180   : > { %v1088_v54 = vrot.slane %v1082_v47, 4  ;;  %v1046_v43 = vrot.slane %v1040_v4, 4  ;;  %v2763_v9 = vcombine.low %v1224_v63, %v1266_v1  ;;  %v2764_v8 = vcombine.high %v1224_v63, %v1266_v1 }
 0x182   : > { %v1095_v31 = vsel %vm409_vm0, %v1087_v49, %v1088_v54  ;;  %v1053_v57 = vsel %vm409_vm0, %v1045_v26, %v1046_v43  ;;  %2318 = vmatprep.subr.bf16.mxu1 %v2764_v8 }
 0x183   : > { %v1168_v24 = vpop.permute.xlu1 %1167  ;;  %v1096_v56 = vsel %vm1091_vm12, %v3573_v2, %v1095_v31  ;;  %v1126_v48 = vpop.permute.xlu0 %1125  ;;  %2319 = vmatpush2.bf16.msra.mxu1 %v2763_v9  ;;  %v1054_v58 = vsel %vm1049_vm15, %v3582_v11, %v1053_v57 }
 0x184   : > { %v1173_v29 = vrot.slane %v1168_v24, 4  ;;  %v1131_v38 = vrot.slane %v1126_v48, 4  ;;  %v2745_v44 = vcombine.low %v1054_v58, %v1096_v56  ;;  %v2746_v10 = vcombine.high %v1054_v58, %v1096_v56 }
 0x185   : > { %v2371_v56 = vunpack.c.h.bf16 %v2369_v62 }
 0x186   : > { %v1181_v49 = vsel %vm409_vm0, %v1172_v19, %v1173_v29  ;;  %v1139_v2 = vsel %vm409_vm0, %v1130_v17, %v1131_v38  ;;  %2281 = vmatprep.subr.bf16.mxu0 %v2746_v10  ;;  %v2421_v19 = vrot.slane %v2381_v25, %v3787_v32 }
 0x187   : > { %v1084_v34 = vpop.permute.xlu1 %1083  ;;  %v1182_v35 = vsel %vm1175_vm14, %v1166_v7, %v1181_v49  ;;  %v1042_v26 = vpop.permute.xlu0 %1041  ;;  %2282 = vmatpush2.bf16.msra.mxu0 %v2745_v44  ;;  %v1140_v53 = vsel %vm1133_vm13, %v1124_v21, %v1139_v2  ;;  %v2377_v7 = vrot.slane %v2370_v15, %v3787_v32  ;;  %v2393_v57 = vrot.slane %v2371_v56, %v3787_v32 }
 0x188   : > { %v1089_v20 = vrot.slane %v1084_v34, 4  ;;  %v1047_v13 = vrot.slane %v1042_v26, 4  ;;  %v2755_v0 = vcombine.low %v1140_v53, %v1182_v35  ;;  %v2756_v39 = vcombine.high %v1140_v53, %v1182_v35 }
 0x189   : > { %v2417_v36 = vrot.slane %v2377_v7, %v3787_v32  ;;  %v2397_v29 = vrot.slane %v2371_v56, %v2380_v27  ;;  %v2433_v48 = vrot.slane %v2393_v57, %v3787_v32  ;;  %v2401_v44 = vrot.slane %v2371_v56, %v2384_v59 }
 0x18a   : > { %v1097_v11 = vsel %vm409_vm0, %v1088_v54, %v1089_v20  ;;  %v1055_v40 = vsel %vm409_vm0, %v1046_v43, %v1047_v13  ;;  %2284 = vmatmul.mubr.bf16.vlgmr.msra.gmra.mxu0 %v3566_v45  ;;  %2320 = vmatprep.subr.bf16.mxu1 %v2756_v39  ;;  %v2405_v20 = vrot.slane %v2371_v56, %v2388_v28 }
 0x18b   : > { %v1098_v12 = vsel %vm1091_vm12, %v1082_v47, %v1097_v11  ;;  %2321 = vmatpush2.bf16.msra.mxu1 %v2755_v0  ;;  %v1056_v50 = vsel %vm1049_vm15, %v1040_v4, %v1055_v40  ;;  %v2437_v58 = vrot.slane %v2397_v29, %v3787_v32  ;;  %v2441_v13 = vrot.slane %v2401_v44, %v3787_v32 }
 0x18c   : > { %v2747_v5 = vcombine.low %v1056_v50, %v1098_v12  ;;  %v2748_v46 = vcombine.high %v1056_v50, %v1098_v12  ;;  %v2445_v12 = vrot.slane %v2405_v20, %v3787_v32 }
 0x18e   : > { %2322 = vmatprep.subr.bf16.mxu1 %v2748_v46 }
 0x18f   : > { %2323 = vmatpush2.bf16.msra.mxu1 %v2747_v5 }
 0x192   : > { %2325 = vmatmul.mubr.bf16.vlgmr.msra.gmra.mxu1 %v3566_v45 }
 0x1e2   : > { %v2203_v21 = vpop.f32.mrf.mxu0 }
 0x1e3   : > { %v2446_v45 = vmul.f32 %v2417_v36, %v2203_v21 }
 0x1e4   : > { %v2205_v17 = vpop.f32.mrf.mxu0 }
 0x1e5   : > { %v2464_v52 = vmul.f32 %v2446_v45, %v2446_v45  ;;  %v2815_v30 = vpack.c.bf16 %v2205_v17, %v2203_v21  ;;  %v2447_v37 = vmul.f32 %v2421_v19, %v2205_v17 }
 0x1e6   : > { %v2207_v16 = vpop.f32.mrf.mxu0 }
 0x1e7   : > { %2365 = vst [vmem:[%s3797_s13] sm:$0xff] %v2815_v30  ;;  %v2454_v33 = vadd.f32 %v2447_v37, %v2446_v45  ;;  %v2465_v41 = vmul.f32 %v2447_v37, %v2447_v37 }
 0x1e8   : > { %v2208_v3 = vpop.f32.mrf.mxu0 }
 0x1e9   : > { %v2472_v6 = vadd.f32 %v2465_v41, %v2464_v52 }
 0x1ee   : > { %v2244_v61 = vpop.f32.mrf.mxu1 }
 0x1ef   : > { %v2448_v14 = vmul.f32 %v2425_v55, %v2244_v61 }
 0x1f0   : > { %v2246_v47 = vpop.f32.mrf.mxu1 }
 0x1f1   : > { %v2455_v1 = vadd.f32 %v2454_v33, %v2448_v14  ;;  %v2466_v60 = vmul.f32 %v2448_v14, %v2448_v14  ;;  %v2816_v54 = vpack.c.bf16 %v2246_v47, %v2244_v61  ;;  %v2449_v4 = vmul.f32 %v2429_v23, %v2246_v47 }
 0x1f2   : > { %v2248_v63 = vpop.f32.mrf.mxu1 }
 0x1f3   : > { %v2473_v43 = vadd.f32 %v2472_v6, %v2466_v60  ;;  %2366 = vst [vmem:[%s3797_s13 + $0x8] sm:$0xff] %v2816_v54  ;;  %v2456_v31 = vadd.f32 %v2455_v1, %v2449_v4  ;;  %v2467_v9 = vmul.f32 %v2449_v4, %v2449_v4 }
 0x1f4   : > { %v2249_v8 = vpop.f32.mrf.mxu1 }
 0x1f5   : > { %v2474_v24 = vadd.f32 %v2473_v43, %v2467_v9 }
 0x24a   : > { %v2285_v38 = vpop.f32.mrf.mxu0 }
 0x24b   : > { %v2450_v49 = vmul.f32 %v2433_v48, %v2285_v38 }
 0x24c   : > { %v2287_v10 = vpop.f32.mrf.mxu0 }
 0x24d   : > { %v2468_v34 = vmul.f32 %v2450_v49, %v2450_v49  ;;  %v2817_v35 = vpack.c.bf16 %v2287_v10, %v2285_v38  ;;  %v2451_v2 = vmul.f32 %v2437_v58, %v2287_v10  ;;  %v2457_v53 = vadd.f32 %v2456_v31, %v2450_v49 }
 0x24e   : > { %v2289_v26 = vpop.f32.mrf.mxu0 }
 0x24f   : > { %2367 = vst [vmem:[%s3797_s13 + $0x10] sm:$0xff] %v2817_v35  ;;  %v2475_v11 = vadd.f32 %v2474_v24, %v2468_v34  ;;  %v2469_v0 = vmul.f32 %v2451_v2, %v2451_v2  ;;  %v2458_v50 = vadd.f32 %v2457_v53, %v2451_v2 }
 0x250   : > { %v2290_v39 = vpop.f32.mrf.mxu0 }
 0x251   : > { %v2476_v46 = vadd.f32 %v2475_v11, %v2469_v0 }
 0x252   : > { %v2326_v40 = vpop.f32.mrf.mxu1 }
 0x253   : > { %v2452_v5 = vmul.f32 %v2441_v13, %v2326_v40 }
 0x254   : > { %v2328_v18 = vpop.f32.mrf.mxu1 }
 0x255   : > { %v2459_v51 = vadd.f32 %v2458_v50, %v2452_v5  ;;  %v2470_v62 = vmul.f32 %v2452_v5, %v2452_v5  ;;  %v2818_v15 = vpack.c.bf16 %v2328_v18, %v2326_v40  ;;  %v2453_v27 = vmul.f32 %v2445_v12, %v2328_v18 }
 0x256   : > { %v2330_v7 = vpop.f32.mrf.mxu1 }
 0x257   : > { %v2477_v25 = vadd.f32 %v2476_v46, %v2470_v62  ;;  %2368 = vst [vmem:[%s3797_s13 + $0x18] sm:$0xff] %v2818_v15  ;;  %v2460_v36 = vadd.f32 %v2459_v51, %v2453_v27  ;;  %v2471_v19 = vmul.f32 %v2453_v27, %v2453_v27 }
 0x258   : > { %v2331_v21 = vpop.f32.mrf.mxu1 }
 0x259   : > { %2461 = vadd.xlane.f32.xlu0 %v2460_v36  ;;  %v2478_v45 = vadd.f32 %v2477_v25, %v2471_v19 }
 0x25b   : > { %2479 = vadd.xlane.f32.xlu1 %v2478_v45 }
 0x2e1   : > { %2497 = sbr.rel (!%p2979_p4) target bundleno = 750 (0x2ee), region = 48 }
 0x2e2   : > { %v2462_v32 = vpop.xlane.xlu0 %2461 }
 0x2e3   : > { %2463 = vst [vmem:[%s329_s19] sm:$0xff] %v2462_v32 }
 0x2e4   : > { %v2480_v59 = vpop.xlane.xlu1 %2479 }
 0x2e5   : > { %2481 = vst [vmem:[%s329_s19 + $0x8] sm:$0xff] %v2480_v59 }
 0x2ea   : > { %v2530_v17 = vld [vmem:[%s329_s19] sm:$0xff] }
 0x2eb   : > { %2531 = vst [vmem:[%s2499_s27] sm:$0xff] %v2530_v17 }
 0x2ec   : > { %v2532_v52 = vld [vmem:[%s329_s19 + $0x8] sm:$0xff] }
 0x2ed   : > { %2533 = vst [vmem:[%s2499_s27 + $0x10] sm:$0xff] %v2532_v52 }
 0x2ee PF: > { %p14_p11 = scmp.ge.s32.totalorder %s2970_s25, 4   ;;  %s3922_s21 = smov %s2890_s22 }
 0x2ef   : > { %s3923_s22 = smov %s2977_s28  ;;  %s3924_s23 = smov %s2970_s25 }
 0x2f0   :  { %16 = sbr.rel (!%p14_p11) target bundleno = 2 (0x2), region = 129 }

</bundles_post_ra>
